<compile_context>
chip_gen: v7x
topology: tpu7x:2x2x1
jax: 0.10.0
libtpu: 0.0.40
codegen_flags: <defaults>
</compile_context>

<pallas_src>
import jax
import jax.numpy as jnp
from jax import lax
from jax.experimental import pallas as pl
from jax.experimental.pallas import tpu as pltpu

# ---------------- configuration ----------------
CONDITION_WINDOW = 8
INPUT_SIZE = 64
HIDDEN_SIZE = 32
CHORD_TYPE = 116          # size of the previous-chord slice of `state`
CHORD_NUM = 72            # output_fc out-dim
OUT_PAD = 128             # lane-dense padded output width
N_LAYERS = 2
STATE_DIM = 24 + 133 + CHORD_TYPE                           # 273
FRONT_DIM = CHORD_TYPE + 72 + 18 * CONDITION_WINDOW + 133   # 465


# ---------------- fused Pallas kernel ----------------------------------------
def _fused_kernel(xin_ref, wfront01_ref, b01_ref,
                  whh0t_ref, wl1_ref, b1_ref,
                  woutt_ref, bout_ref,
                  h0_ref, c0_ref,
                  out_ref, hn_ref, cn_ref):
    N = xin_ref.shape[0]
    B = h0_ref.shape[1]
    H = h0_ref.shape[2]
    T = N // B

    # --- front end + layer-0 input projection fused into ONE batched matmul
    #     (fc_embedding, fc_t, input_linear and W_ih0 all folded at prep time).
    #     gx stays a traced value: (N, 4H) = (16, 128) f32 = 2 vregs. ---
    gx = jnp.dot(xin_ref[...], wfront01_ref[...],
                 preferred_element_type=jnp.float32) + b01_ref[...]       # (N, 4H)

    # --- weights / biases loaded once, kept in vregs ---
    whh0 = whh0t_ref[...]       # (H, 4H)
    wl1 = wl1_ref[...]          # (2H, 4H)  == [W_ih1^T ; W_hh1^T]
    b1 = b1_ref[...]            # (1, 4H)

    # --- recurrent state carried as traced values (no VMEM round-trips) ---
    h0 = h0_ref[0]
    c0 = c0_ref[0]
    h1 = h0_ref[1]
    c1 = c0_ref[1]

    def gates_to_hc(gates, c_prev):
        # PyTorch LSTM gate order: i, f, g, o.  Two EUP issues per cell:
        # sigmoid and tanh over the whole (B, 4H) vreg, then lane-slice.
        sg = jax.nn.sigmoid(gates)
        th = jnp.tanh(gates)
        i = sg[:, 0:H]
        f = sg[:, H:2 * H]
        g = th[:, 2 * H:3 * H]
        o = sg[:, 3 * H:4 * H]
        c_new = f * c_prev + i * g
        h_new = o * jnp.tanh(c_new)
        return h_new, c_new

    # --- fully-unrolled recurrence (T small & static): only the recurrent
    #     matmuls + gate elementwise math remain on the serial path. ---
    hs = []
    for t in range(T):
        g0 = gx[t * B:(t + 1) * B, :] + jnp.dot(
            h0, whh0, preferred_element_type=jnp.float32)
        h0, c0 = gates_to_hc(g0, c0)

        g1 = jnp.dot(jnp.concatenate([h0, h1], axis=-1), wl1,
                     preferred_element_type=jnp.float32) + b1
        h1, c1 = gates_to_hc(g1, c1)
        hs.append(h1)

    hs_all = jnp.concatenate(hs, axis=0)                                   # (N, H)

    # --- output_fc + log-softmax, batched over all timesteps.
    #     Weights padded to 128 lanes (zero cols), bias pad = -1e9 so padded
    #     lanes contribute exp(...) == 0 to the lse.  Padded lanes of out_ref
    #     hold ~-1e9 garbage; the wrapper MUST slice [..., :CHORD_NUM]. ---
    logits = jnp.dot(hs_all, woutt_ref[...],
                     preferred_element_type=jnp.float32) + bout_ref[...]   # (N, 128)
    m = jnp.max(logits, axis=-1, keepdims=True)
    lse = m + jnp.log(jnp.sum(jnp.exp(logits - m), axis=-1, keepdims=True))
    out_ref[...] = logits - lse            # lane-dense (N, 128) store

    # single final writeback of the recurrent state
    hn_ref[0] = h0
    hn_ref[1] = h1
    cn_ref[0] = c0
    cn_ref[1] = c1


# ---------------- parameter init (deterministic, PyTorch-like shapes) --------
def init_params(key):
    ks = jax.random.split(key, 19)

    def unif(k, shape, fan_in):
        bound = 1.0 / jnp.sqrt(jnp.float32(fan_in))
        return jax.random.uniform(k, shape, jnp.float32, -bound, bound)

    H = HIDDEN_SIZE
    return dict(
        p_table=jax.random.normal(ks[0], (49, 6), jnp.float32),
        d_table=jax.random.normal(ks[1], (12, 4), jnp.float32),
        b_table=jax.random.normal(ks[2], (72, 8), jnp.float32),
        W_fce=unif(ks[3], (16, 18 * CONDITION_WINDOW), 18 * CONDITION_WINDOW),
        b_fce=unif(ks[4], (16,), 18 * CONDITION_WINDOW),
        W_fct=unif(ks[5], (16, 133), 133),
        b_fct=unif(ks[6], (16,), 133),
        W_il=unif(ks[7], (INPUT_SIZE, 220), 220),
        b_il=unif(ks[8], (INPUT_SIZE,), 220),
        W_ih0=unif(ks[9], (4 * H, INPUT_SIZE), H),
        W_hh0=unif(ks[10], (4 * H, H), H),
        b_ih0=unif(ks[11], (4 * H,), H),
        b_hh0=unif(ks[12], (4 * H,), H),
        W_ih1=unif(ks[13], (4 * H, H), H),
        W_hh1=unif(ks[14], (4 * H, H), H),
        b_ih1=unif(ks[15], (4 * H,), H),
        b_hh1=unif(ks[16], (4 * H,), H),
        W_out=unif(ks[17], (CHORD_NUM, H), H),
        b_out=unif(ks[18], (CHORD_NUM,), H),
    )


# ---------------- one-time weight prep (transpose / split / fold / pad) ------
def prepare_params(params):
    H = HIDDEN_SIZE
    hp = lax.Precision.HIGHEST
    W_il = params["W_il"]                                         # (64, 220)
    # input_linear column blocks: [pre_chord(116) | b_note(72) | fc_emb(16) | fc_t(16)]
    W_pcbn = W_il[:, :CHORD_TYPE + 72].T                          # (188, 64)
    W_e = W_il[:, CHORD_TYPE + 72:CHORD_TYPE + 72 + 16].T         # (16, 64)
    W_n = W_il[:, CHORD_TYPE + 72 + 16:].T                        # (16, 64)
    # fold fc_embedding / fc_t into input_linear (exact linear identity)
    W_emb = jnp.dot(params["W_fce"].T, W_e, precision=hp)         # (144, 64)
    W_note = jnp.dot(params["W_fct"].T, W_n, precision=hp)        # (133, 64)
    b_front = (params["b_il"]
               + jnp.dot(params["b_fce"], W_e, precision=hp)
               + jnp.dot(params["b_fct"], W_n, precision=hp))     # (64,)
    W_front = jnp.concatenate([W_pcbn, W_emb, W_note], axis=0)    # (465, 64)

    # fold W_ih0^T (and the layer-0 biases) into the front weight as well:
    # gx = xin @ W_front01 + b01   (exact linear identity)
    W_ih0T = params["W_ih0"].T                                    # (64, 128)
    b0 = params["b_ih0"] + params["b_hh0"]                        # (128,)
    W_front01 = jnp.dot(W_front, W_ih0T, precision=hp)            # (465, 128)
    b01 = jnp.dot(b_front, W_ih0T, precision=hp) + b0             # (128,)

    # merged layer-1 recurrent weight: [W_ih1^T ; W_hh1^T] -> (2H, 4H)
    W_l1_cat = jnp.concatenate([params["W_ih1"].T, params["W_hh1"].T], axis=0)

    # lane-dense padded output head (72 -> 128)
    W_out_pad = jnp.zeros((H, OUT_PAD), jnp.float32).at[:, :CHORD_NUM].set(
        params["W_out"].T)
    b_out_pad = jnp.full((OUT_PAD,), -1e9, jnp.float32).at[:CHORD_NUM].set(
        params["b_out"])

    return dict(
        p_table=params["p_table"], d_table=params["d_table"],
        b_table=params["b_table"],
        W_front01=W_front01, b01=b01[None, :],
        W_hh0T=params["W_hh0"].T,
        W_l1_cat=W_l1_cat,
        b1=(params["b_ih1"] + params["b_hh1"])[None, :],
        W_out_pad=W_out_pad, b_out_pad=b_out_pad[None, :],
    )


# ---------------- forward wrapper --------------------------------------------
def lstm_chord_forward(prep, state, hidden=None):
    T, B, _ = state.shape

    # --- split state (torch.split([24, 133, chord_type], dim=-1)) ---
    cond = state[..., :24].astype(jnp.int32)
    note = state[..., 24:157]                                  # (T, B, 133)
    pre_chord = state[..., 157:157 + CHORD_TYPE]               # (T, B, 116)

    # --- embedding lookups (plain-JAX gather glue) ---
    p_emb = jnp.take(prep["p_table"], cond[..., 0:8], axis=0)   # (T,B,8,6)
    d_emb = jnp.take(prep["d_table"], cond[..., 8:16], axis=0)  # (T,B,8,4)
    b_emb = jnp.take(prep["b_table"], cond[..., 16:24], axis=0) # (T,B,8,8)
    emb = jnp.concatenate([p_emb, d_emb, b_emb], axis=-1).reshape(
        T, B, 18 * CONDITION_WINDOW)                            # (T,B,144)
    b_note = note[..., 61:133]                                  # (T, B, 72)

    # kernel front-end input: [pre_chord | b_note | emb144 | note133]
    xin = jnp.concatenate([pre_chord, b_note, emb, note],
                          axis=-1).reshape(T * B, FRONT_DIM)    # (N, 465)

    if hidden is None:
        h0 = jnp.zeros((N_LAYERS, B, HIDDEN_SIZE), jnp.float32)
        c0 = jnp.zeros((N_LAYERS, B, HIDDEN_SIZE), jnp.float32)
    else:
        h0, c0 = hidden

    N = T * B
    H = HIDDEN_SIZE
    vmem = pl.BlockSpec(memory_space=pltpu.MemorySpace.VMEM)

    # advisory cost hint for XLA's scheduler around the custom call
    flops = (2 * N * FRONT_DIM * 4 * H                       # front + layer-0 gates
             + T * (2 * B * H * 4 * H + 2 * B * 2 * H * 4 * H)  # recurrence
             + 2 * N * H * OUT_PAD)                          # output head
    transcend = T * 2 * (2 * B * 4 * H + B * H) + N * OUT_PAD + N
    bytes_acc = (xin.size + prep["W_front01"].size + prep["W_out_pad"].size
                 + N * OUT_PAD + 4 * N_LAYERS * B * H + 512) * 4

    out_pad, hn, cn = pl.pallas_call(
        _fused_kernel,
        out_shape=(
            jax.ShapeDtypeStruct((N, OUT_PAD), jnp.float32),
            jax.ShapeDtypeStruct((N_LAYERS, B, HIDDEN_SIZE), jnp.float32),
            jax.ShapeDtypeStruct((N_LAYERS, B, HIDDEN_SIZE), jnp.float32),
        ),
        in_specs=[vmem] * 10,
        out_specs=(vmem, vmem, vmem),
        cost_estimate=pl.CostEstimate(
            flops=int(flops), transcendentals=int(transcend),
            bytes_accessed=int(bytes_acc)),
    )(xin, prep["W_front01"], prep["b01"],
      prep["W_hh0T"], prep["W_l1_cat"], prep["b1"],
      prep["W_out_pad"], prep["b_out_pad"],
      h0, c0)

    out = out_pad[:, :CHORD_NUM].reshape(T, B, CHORD_NUM)
    return out, (hn, cn)


# ---------------- pure-JAX reference for correctness check -------------------
def _reference_forward(params, state, chord_type=CHORD_TYPE, hidden=None):
    T, B, _ = state.shape
    cond = state[..., :24].astype(jnp.int32)
    note = state[..., 24:157]
    pre_chord = state[..., 157:157 + chord_type]
    p_emb = params["p_table"][cond[..., 0:8]]
    d_emb = params["d_table"][cond[..., 8:16]]
    b_emb = params["b_table"][cond[..., 16:24]]
    emb = jnp.concatenate([p_emb, d_emb, b_emb], -1).reshape(T, B, -1)
    emb16 = emb @ params["W_fce"].T + params["b_fce"]
    nt16 = note @ params["W_fct"].T + params["b_fct"]
    b_note = note[..., 61:]
    inputs = jnp.concatenate([pre_chord, b_note, emb16, nt16], -1)
    x = inputs @ params["W_il"].T + params["b_il"]

    H = HIDDEN_SIZE
    if hidden is None:
        h = jnp.zeros((N_LAYERS, B, H), jnp.float32)
        c = jnp.zeros_like(h)
    else:
        h, c = hidden

    def cell(xt, hp, cp, wih, whh, bih, bhh):
        g = xt @ wih.T + bih + hp @ whh.T + bhh
        i = jax.nn.sigmoid(g[:, :H]); f = jax.nn.sigmoid(g[:, H:2 * H])
        gg = jnp.tanh(g[:, 2 * H:3 * H]); o = jax.nn.sigmoid(g[:, 3 * H:])
        cn = f * cp + i * gg
        return o * jnp.tanh(cn), cn

    def scan_fn(carry, xt):
        h0, c0, h1, c1 = carry
        h0, c0 = cell(xt, h0, c0, params["W_ih0"], params["W_hh0"],
                      params["b_ih0"], params["b_hh0"])
        h1, c1 = cell(h0, h1, c1, params["W_ih1"], params["W_hh1"],
                      params["b_ih1"], params["b_hh1"])
        return (h0, c0, h1, c1), h1

    (h0f, c0f, h1f, c1f), ys = lax.scan(scan_fn, (h[0], c[0], h[1], c[1]), x)
    logits = ys @ params["W_out"].T + params["b_out"]
    out = jax.nn.log_softmax(logits, axis=-1)
    return out, (jnp.stack([h0f, h1f]), jnp.stack([c0f, c1f]))


# ---------------- main --------------------------------------------------------
if __name__ == "__main__":
    key = jax.random.PRNGKey(0)
    pkey, k1, k2, k3, k4, k5, k6, k7 = jax.random.split(key, 8)
    params = init_params(pkey)
    prep = prepare_params(params)          # one-time weight layout prep

    T, B = 8, 2   # small seq / batch

    # condition indices (stored as float, cast to int inside the wrapper)
    p_idx = jax.random.randint(k1, (T, B, 8), 0, 49)
    d_idx = jax.random.randint(k2, (T, B, 8), 0, 12)
    b_idx = jax.random.randint(k3, (T, B, 8), 0, 72)
    cond = jnp.concatenate([p_idx, d_idx, b_idx], axis=-1).astype(jnp.float32)

    # note one-hots (49 + 12 + 72 = 133) and previous-chord one-hot (116)
    note = jnp.concatenate([
        jax.nn.one_hot(jax.random.randint(k4, (T, B), 0, 49), 49, dtype=jnp.float32),
        jax.nn.one_hot(jax.random.randint(k5, (T, B), 0, 12), 12, dtype=jnp.float32),
        jax.nn.one_hot(jax.random.randint(k6, (T, B), 0, 72), 72, dtype=jnp.float32),
    ], axis=-1)
    pre_chord = jax.nn.one_hot(
        jax.random.randint(k7, (T, B), 0, CHORD_TYPE), CHORD_TYPE, dtype=jnp.float32)

    state = jnp.concatenate([cond, note, pre_chord], axis=-1)   # (T, B, 273)
    assert state.shape == (T, B, STATE_DIM)

    fwd = jax.jit(lstm_chord_forward)
    out, (hn, cn) = fwd(prep, state)
    jax.block_until_ready((out, hn, cn))

    ref_out, (ref_hn, ref_cn) = _reference_forward(params, state)
    assert out.shape == (T, B, CHORD_NUM)
    assert hn.shape == (N_LAYERS, B, HIDDEN_SIZE) and cn.shape == (N_LAYERS, B, HIDDEN_SIZE)
    assert jnp.allclose(out, ref_out, atol=5e-4, rtol=5e-4)
    assert jnp.allclose(hn, ref_hn, atol=5e-4, rtol=5e-4)
    assert jnp.allclose(cn, ref_cn, atol=5e-4, rtol=5e-4)

    print("KERNEL_OK")
</pallas_src>

<mosaic_0001>
module attributes {stable_mosaic.version = 11 : i64} {
  func.func @_fused_kernel(%arg0: memref<16x465xf32, #tpu.memory_space<vmem>>, %arg1: memref<465x128xf32, #tpu.memory_space<vmem>>, %arg2: memref<1x128xf32, #tpu.memory_space<vmem>>, %arg3: memref<32x128xf32, #tpu.memory_space<vmem>>, %arg4: memref<64x128xf32, #tpu.memory_space<vmem>>, %arg5: memref<1x128xf32, #tpu.memory_space<vmem>>, %arg6: memref<32x128xf32, #tpu.memory_space<vmem>>, %arg7: memref<1x128xf32, #tpu.memory_space<vmem>>, %arg8: memref<2x2x32xf32, #tpu.memory_space<vmem>>, %arg9: memref<2x2x32xf32, #tpu.memory_space<vmem>>, %arg10: memref<16x128xf32, #tpu.memory_space<vmem>>, %arg11: memref<2x2x32xf32, #tpu.memory_space<vmem>>, %arg12: memref<2x2x32xf32, #tpu.memory_space<vmem>>) attributes {dimension_semantics = [], scalar_prefetch = 0 : i64, scratch_operands = 0 : i64, tpu.core_type = #tpu.core_type<tc>} {
    %c0 = arith.constant 0 : index
    %c0_0 = arith.constant 0 : index
    %0 = vector.load %arg0[%c0, %c0_0] : memref<16x465xf32, #tpu.memory_space<vmem>>, vector<16x465xf32>
    %c0_1 = arith.constant 0 : index
    %c0_2 = arith.constant 0 : index
    %1 = vector.load %arg1[%c0_1, %c0_2] : memref<465x128xf32, #tpu.memory_space<vmem>>, vector<465x128xf32>
    %cst = arith.constant dense<0.000000e+00> : vector<16x128xf32>
    %2 = tpu.matmul %0, %1, %cst {dimension_numbers = #tpu.dot_dimension_numbers<[1], [0], [0], [1], [0, 0, 1, 1], [], []>} : vector<16x465xf32>, vector<465x128xf32>, vector<16x128xf32> -> vector<16x128xf32>
    %c0_3 = arith.constant 0 : index
    %c0_4 = arith.constant 0 : index
    %3 = vector.load %arg2[%c0_3, %c0_4] : memref<1x128xf32, #tpu.memory_space<vmem>>, vector<1x128xf32>
    %4 = vector.broadcast %3 : vector<1x128xf32> to vector<16x128xf32>
    %5 = arith.addf %2, %4 : vector<16x128xf32>
    %c0_5 = arith.constant 0 : index
    %c0_6 = arith.constant 0 : index
    %6 = vector.load %arg3[%c0_5, %c0_6] : memref<32x128xf32, #tpu.memory_space<vmem>>, vector<32x128xf32>
    %c0_7 = arith.constant 0 : index
    %c0_8 = arith.constant 0 : index
    %7 = vector.load %arg4[%c0_7, %c0_8] : memref<64x128xf32, #tpu.memory_space<vmem>>, vector<64x128xf32>
    %c0_9 = arith.constant 0 : index
    %c0_10 = arith.constant 0 : index
    %8 = vector.load %arg5[%c0_9, %c0_10] : memref<1x128xf32, #tpu.memory_space<vmem>>, vector<1x128xf32>
    %c0_11 = arith.constant 0 : index
    %c0_12 = arith.constant 0 : index
    %c0_13 = arith.constant 0 : index
    %9 = vector.load %arg8[%c0_11, %c0_12, %c0_13] : memref<2x2x32xf32, #tpu.memory_space<vmem>>, vector<1x2x32xf32>
    %10 = vector.shape_cast %9 : vector<1x2x32xf32> to vector<2x32xf32>
    %c0_14 = arith.constant 0 : index
    %c0_15 = arith.constant 0 : index
    %c0_16 = arith.constant 0 : index
    %11 = vector.load %arg9[%c0_14, %c0_15, %c0_16] : memref<2x2x32xf32, #tpu.memory_space<vmem>>, vector<1x2x32xf32>
    %12 = vector.shape_cast %11 : vector<1x2x32xf32> to vector<2x32xf32>
    %c1 = arith.constant 1 : index
    %c0_17 = arith.constant 0 : index
    %c0_18 = arith.constant 0 : index
    %13 = vector.load %arg8[%c1, %c0_17, %c0_18] : memref<2x2x32xf32, #tpu.memory_space<vmem>>, vector<1x2x32xf32>
    %14 = vector.shape_cast %13 : vector<1x2x32xf32> to vector<2x32xf32>
    %c1_19 = arith.constant 1 : index
    %c0_20 = arith.constant 0 : index
    %c0_21 = arith.constant 0 : index
    %15 = vector.load %arg9[%c1_19, %c0_20, %c0_21] : memref<2x2x32xf32, #tpu.memory_space<vmem>>, vector<1x2x32xf32>
    %16 = vector.shape_cast %15 : vector<1x2x32xf32> to vector<2x32xf32>
    %17 = vector.extract_strided_slice %5 {offsets = [0, 0], sizes = [2, 128], strides = [1, 1]} : vector<16x128xf32> to vector<2x128xf32>
    %cst_22 = arith.constant dense<0.000000e+00> : vector<2x128xf32>
    %18 = tpu.matmul %10, %6, %cst_22 {dimension_numbers = #tpu.dot_dimension_numbers<[1], [0], [0], [1], [0, 0, 1, 1], [], []>} : vector<2x32xf32>, vector<32x128xf32>, vector<2x128xf32> -> vector<2x128xf32>
    %19 = arith.addf %17, %18 : vector<2x128xf32>
    %20 = arith.negf %19 : vector<2x128xf32>
    %21 = math.exp %20 : vector<2x128xf32>
    %cst_23 = arith.constant 1.000000e+00 : f32
    %22 = vector.broadcast %cst_23 : f32 to vector<2x128xf32>
    %23 = arith.addf %22, %21 : vector<2x128xf32>
    %24 = arith.divf %22, %23 : vector<2x128xf32>
    %25 = math.tanh %19 : vector<2x128xf32>
    %26 = vector.extract_strided_slice %24 {offsets = [0, 0], sizes = [2, 32], strides = [1, 1]} : vector<2x128xf32> to vector<2x32xf32>
    %27 = vector.extract_strided_slice %24 {offsets = [0, 32], sizes = [2, 32], strides = [1, 1]} : vector<2x128xf32> to vector<2x32xf32>
    %28 = vector.extract_strided_slice %25 {offsets = [0, 64], sizes = [2, 32], strides = [1, 1]} : vector<2x128xf32> to vector<2x32xf32>
    %29 = vector.extract_strided_slice %24 {offsets = [0, 96], sizes = [2, 32], strides = [1, 1]} : vector<2x128xf32> to vector<2x32xf32>
    %30 = arith.mulf %27, %12 : vector<2x32xf32>
    %31 = arith.mulf %26, %28 : vector<2x32xf32>
    %32 = arith.addf %30, %31 : vector<2x32xf32>
    %33 = math.tanh %32 : vector<2x32xf32>
    %34 = arith.mulf %29, %33 : vector<2x32xf32>
    %35 = tpu.concatenate %34, %14 in 1 : vector<2x32xf32>, vector<2x32xf32> -> vector<2x64xf32>
    %cst_24 = arith.constant dense<0.000000e+00> : vector<2x128xf32>
    %36 = tpu.matmul %35, %7, %cst_24 {dimension_numbers = #tpu.dot_dimension_numbers<[1], [0], [0], [1], [0, 0, 1, 1], [], []>} : vector<2x64xf32>, vector<64x128xf32>, vector<2x128xf32> -> vector<2x128xf32>
    %37 = vector.broadcast %8 : vector<1x128xf32> to vector<2x128xf32>
    %38 = arith.addf %36, %37 : vector<2x128xf32>
    %39 = arith.negf %38 : vector<2x128xf32>
    %40 = math.exp %39 : vector<2x128xf32>
    %cst_25 = arith.constant 1.000000e+00 : f32
    %41 = vector.broadcast %cst_25 : f32 to vector<2x128xf32>
    %42 = arith.addf %41, %40 : vector<2x128xf32>
    %43 = arith.divf %41, %42 : vector<2x128xf32>
    %44 = math.tanh %38 : vector<2x128xf32>
    %45 = vector.extract_strided_slice %43 {offsets = [0, 0], sizes = [2, 32], strides = [1, 1]} : vector<2x128xf32> to vector<2x32xf32>
    %46 = vector.extract_strided_slice %43 {offsets = [0, 32], sizes = [2, 32], strides = [1, 1]} : vector<2x128xf32> to vector<2x32xf32>
    %47 = vector.extract_strided_slice %44 {offsets = [0, 64], sizes = [2, 32], strides = [1, 1]} : vector<2x128xf32> to vector<2x32xf32>
    %48 = vector.extract_strided_slice %43 {offsets = [0, 96], sizes = [2, 32], strides = [1, 1]} : vector<2x128xf32> to vector<2x32xf32>
    %49 = arith.mulf %46, %16 : vector<2x32xf32>
    %50 = arith.mulf %45, %47 : vector<2x32xf32>
    %51 = arith.addf %49, %50 : vector<2x32xf32>
    %52 = math.tanh %51 : vector<2x32xf32>
    %53 = arith.mulf %48, %52 : vector<2x32xf32>
    %54 = vector.extract_strided_slice %5 {offsets = [2, 0], sizes = [2, 128], strides = [1, 1]} : vector<16x128xf32> to vector<2x128xf32>
    %cst_26 = arith.constant dense<0.000000e+00> : vector<2x128xf32>
    %55 = tpu.matmul %34, %6, %cst_26 {dimension_numbers = #tpu.dot_dimension_numbers<[1], [0], [0], [1], [0, 0, 1, 1], [], []>} : vector<2x32xf32>, vector<32x128xf32>, vector<2x128xf32> -> vector<2x128xf32>
    %56 = arith.addf %54, %55 : vector<2x128xf32>
    %57 = arith.negf %56 : vector<2x128xf32>
    %58 = math.exp %57 : vector<2x128xf32>
    %cst_27 = arith.constant 1.000000e+00 : f32
    %59 = vector.broadcast %cst_27 : f32 to vector<2x128xf32>
    %60 = arith.addf %59, %58 : vector<2x128xf32>
    %61 = arith.divf %59, %60 : vector<2x128xf32>
    %62 = math.tanh %56 : vector<2x128xf32>
    %63 = vector.extract_strided_slice %61 {offsets = [0, 0], sizes = [2, 32], strides = [1, 1]} : vector<2x128xf32> to vector<2x32xf32>
    %64 = vector.extract_strided_slice %61 {offsets = [0, 32], sizes = [2, 32], strides = [1, 1]} : vector<2x128xf32> to vector<2x32xf32>
    %65 = vector.extract_strided_slice %62 {offsets = [0, 64], sizes = [2, 32], strides = [1, 1]} : vector<2x128xf32> to vector<2x32xf32>
    %66 = vector.extract_strided_slice %61 {offsets = [0, 96], sizes = [2, 32], strides = [1, 1]} : vector<2x128xf32> to vector<2x32xf32>
    %67 = arith.mulf %64, %32 : vector<2x32xf32>
    %68 = arith.mulf %63, %65 : vector<2x32xf32>
    %69 = arith.addf %67, %68 : vector<2x32xf32>
    %70 = math.tanh %69 : vector<2x32xf32>
    %71 = arith.mulf %66, %70 : vector<2x32xf32>
    %72 = tpu.concatenate %71, %53 in 1 : vector<2x32xf32>, vector<2x32xf32> -> vector<2x64xf32>
    %cst_28 = arith.constant dense<0.000000e+00> : vector<2x128xf32>
    %73 = tpu.matmul %72, %7, %cst_28 {dimension_numbers = #tpu.dot_dimension_numbers<[1], [0], [0], [1], [0, 0, 1, 1], [], []>} : vector<2x64xf32>, vector<64x128xf32>, vector<2x128xf32> -> vector<2x128xf32>
    %74 = vector.broadcast %8 : vector<1x128xf32> to vector<2x128xf32>
    %75 = arith.addf %73, %74 : vector<2x128xf32>
    %76 = arith.negf %75 : vector<2x128xf32>
    %77 = math.exp %76 : vector<2x128xf32>
    %cst_29 = arith.constant 1.000000e+00 : f32
    %78 = vector.broadcast %cst_29 : f32 to vector<2x128xf32>
    %79 = arith.addf %78, %77 : vector<2x128xf32>
    %80 = arith.divf %78, %79 : vector<2x128xf32>
    %81 = math.tanh %75 : vector<2x128xf32>
    %82 = vector.extract_strided_slice %80 {offsets = [0, 0], sizes = [2, 32], strides = [1, 1]} : vector<2x128xf32> to vector<2x32xf32>
    %83 = vector.extract_strided_slice %80 {offsets = [0, 32], sizes = [2, 32], strides = [1, 1]} : vector<2x128xf32> to vector<2x32xf32>
    %84 = vector.extract_strided_slice %81 {offsets = [0, 64], sizes = [2, 32], strides = [1, 1]} : vector<2x128xf32> to vector<2x32xf32>
    %85 = vector.extract_strided_slice %80 {offsets = [0, 96], sizes = [2, 32], strides = [1, 1]} : vector<2x128xf32> to vector<2x32xf32>
    %86 = arith.mulf %83, %51 : vector<2x32xf32>
    %87 = arith.mulf %82, %84 : vector<2x32xf32>
    %88 = arith.addf %86, %87 : vector<2x32xf32>
    %89 = math.tanh %88 : vector<2x32xf32>
    %90 = arith.mulf %85, %89 : vector<2x32xf32>
    %91 = vector.extract_strided_slice %5 {offsets = [4, 0], sizes = [2, 128], strides = [1, 1]} : vector<16x128xf32> to vector<2x128xf32>
    %cst_30 = arith.constant dense<0.000000e+00> : vector<2x128xf32>
    %92 = tpu.matmul %71, %6, %cst_30 {dimension_numbers = #tpu.dot_dimension_numbers<[1], [0], [0], [1], [0, 0, 1, 1], [], []>} : vector<2x32xf32>, vector<32x128xf32>, vector<2x128xf32> -> vector<2x128xf32>
    %93 = arith.addf %91, %92 : vector<2x128xf32>
    %94 = arith.negf %93 : vector<2x128xf32>
    %95 = math.exp %94 : vector<2x128xf32>
    %cst_31 = arith.constant 1.000000e+00 : f32
    %96 = vector.broadcast %cst_31 : f32 to vector<2x128xf32>
    %97 = arith.addf %96, %95 : vector<2x128xf32>
    %98 = arith.divf %96, %97 : vector<2x128xf32>
    %99 = math.tanh %93 : vector<2x128xf32>
    %100 = vector.extract_strided_slice %98 {offsets = [0, 0], sizes = [2, 32], strides = [1, 1]} : vector<2x128xf32> to vector<2x32xf32>
    %101 = vector.extract_strided_slice %98 {offsets = [0, 32], sizes = [2, 32], strides = [1, 1]} : vector<2x128xf32> to vector<2x32xf32>
    %102 = vector.extract_strided_slice %99 {offsets = [0, 64], sizes = [2, 32], strides = [1, 1]} : vector<2x128xf32> to vector<2x32xf32>
    %103 = vector.extract_strided_slice %98 {offsets = [0, 96], sizes = [2, 32], strides = [1, 1]} : vector<2x128xf32> to vector<2x32xf32>
    %104 = arith.mulf %101, %69 : vector<2x32xf32>
    %105 = arith.mulf %100, %102 : vector<2x32xf32>
    %106 = arith.addf %104, %105 : vector<2x32xf32>
    %107 = math.tanh %106 : vector<2x32xf32>
    %108 = arith.mulf %103, %107 : vector<2x32xf32>
    %109 = tpu.concatenate %108, %90 in 1 : vector<2x32xf32>, vector<2x32xf32> -> vector<2x64xf32>
    %cst_32 = arith.constant dense<0.000000e+00> : vector<2x128xf32>
    %110 = tpu.matmul %109, %7, %cst_32 {dimension_numbers = #tpu.dot_dimension_numbers<[1], [0], [0], [1], [0, 0, 1, 1], [], []>} : vector<2x64xf32>, vector<64x128xf32>, vector<2x128xf32> -> vector<2x128xf32>
    %111 = vector.broadcast %8 : vector<1x128xf32> to vector<2x128xf32>
    %112 = arith.addf %110, %111 : vector<2x128xf32>
    %113 = arith.negf %112 : vector<2x128xf32>
    %114 = math.exp %113 : vector<2x128xf32>
    %cst_33 = arith.constant 1.000000e+00 : f32
    %115 = vector.broadcast %cst_33 : f32 to vector<2x128xf32>
    %116 = arith.addf %115, %114 : vector<2x128xf32>
    %117 = arith.divf %115, %116 : vector<2x128xf32>
    %118 = math.tanh %112 : vector<2x128xf32>
    %119 = vector.extract_strided_slice %117 {offsets = [0, 0], sizes = [2, 32], strides = [1, 1]} : vector<2x128xf32> to vector<2x32xf32>
    %120 = vector.extract_strided_slice %117 {offsets = [0, 32], sizes = [2, 32], strides = [1, 1]} : vector<2x128xf32> to vector<2x32xf32>
    %121 = vector.extract_strided_slice %118 {offsets = [0, 64], sizes = [2, 32], strides = [1, 1]} : vector<2x128xf32> to vector<2x32xf32>
    %122 = vector.extract_strided_slice %117 {offsets = [0, 96], sizes = [2, 32], strides = [1, 1]} : vector<2x128xf32> to vector<2x32xf32>
    %123 = arith.mulf %120, %88 : vector<2x32xf32>
    %124 = arith.mulf %119, %121 : vector<2x32xf32>
    %125 = arith.addf %123, %124 : vector<2x32xf32>
    %126 = math.tanh %125 : vector<2x32xf32>
    %127 = arith.mulf %122, %126 : vector<2x32xf32>
    %128 = vector.extract_strided_slice %5 {offsets = [6, 0], sizes = [2, 128], strides = [1, 1]} : vector<16x128xf32> to vector<2x128xf32>
    %cst_34 = arith.constant dense<0.000000e+00> : vector<2x128xf32>
    %129 = tpu.matmul %108, %6, %cst_34 {dimension_numbers = #tpu.dot_dimension_numbers<[1], [0], [0], [1], [0, 0, 1, 1], [], []>} : vector<2x32xf32>, vector<32x128xf32>, vector<2x128xf32> -> vector<2x128xf32>
    %130 = arith.addf %128, %129 : vector<2x128xf32>
    %131 = arith.negf %130 : vector<2x128xf32>
    %132 = math.exp %131 : vector<2x128xf32>
    %cst_35 = arith.constant 1.000000e+00 : f32
    %133 = vector.broadcast %cst_35 : f32 to vector<2x128xf32>
    %134 = arith.addf %133, %132 : vector<2x128xf32>
    %135 = arith.divf %133, %134 : vector<2x128xf32>
    %136 = math.tanh %130 : vector<2x128xf32>
    %137 = vector.extract_strided_slice %135 {offsets = [0, 0], sizes = [2, 32], strides = [1, 1]} : vector<2x128xf32> to vector<2x32xf32>
    %138 = vector.extract_strided_slice %135 {offsets = [0, 32], sizes = [2, 32], strides = [1, 1]} : vector<2x128xf32> to vector<2x32xf32>
    %139 = vector.extract_strided_slice %136 {offsets = [0, 64], sizes = [2, 32], strides = [1, 1]} : vector<2x128xf32> to vector<2x32xf32>
    %140 = vector.extract_strided_slice %135 {offsets = [0, 96], sizes = [2, 32], strides = [1, 1]} : vector<2x128xf32> to vector<2x32xf32>
    %141 = arith.mulf %138, %106 : vector<2x32xf32>
    %142 = arith.mulf %137, %139 : vector<2x32xf32>
    %143 = arith.addf %141, %142 : vector<2x32xf32>
    %144 = math.tanh %143 : vector<2x32xf32>
    %145 = arith.mulf %140, %144 : vector<2x32xf32>
    %146 = tpu.concatenate %145, %127 in 1 : vector<2x32xf32>, vector<2x32xf32> -> vector<2x64xf32>
    %cst_36 = arith.constant dense<0.000000e+00> : vector<2x128xf32>
    %147 = tpu.matmul %146, %7, %cst_36 {dimension_numbers = #tpu.dot_dimension_numbers<[1], [0], [0], [1], [0, 0, 1, 1], [], []>} : vector<2x64xf32>, vector<64x128xf32>, vector<2x128xf32> -> vector<2x128xf32>
    %148 = vector.broadcast %8 : vector<1x128xf32> to vector<2x128xf32>
    %149 = arith.addf %147, %148 : vector<2x128xf32>
    %150 = arith.negf %149 : vector<2x128xf32>
    %151 = math.exp %150 : vector<2x128xf32>
    %cst_37 = arith.constant 1.000000e+00 : f32
    %152 = vector.broadcast %cst_37 : f32 to vector<2x128xf32>
    %153 = arith.addf %152, %151 : vector<2x128xf32>
    %154 = arith.divf %152, %153 : vector<2x128xf32>
    %155 = math.tanh %149 : vector<2x128xf32>
    %156 = vector.extract_strided_slice %154 {offsets = [0, 0], sizes = [2, 32], strides = [1, 1]} : vector<2x128xf32> to vector<2x32xf32>
    %157 = vector.extract_strided_slice %154 {offsets = [0, 32], sizes = [2, 32], strides = [1, 1]} : vector<2x128xf32> to vector<2x32xf32>
    %158 = vector.extract_strided_slice %155 {offsets = [0, 64], sizes = [2, 32], strides = [1, 1]} : vector<2x128xf32> to vector<2x32xf32>
    %159 = vector.extract_strided_slice %154 {offsets = [0, 96], sizes = [2, 32], strides = [1, 1]} : vector<2x128xf32> to vector<2x32xf32>
    %160 = arith.mulf %157, %125 : vector<2x32xf32>
    %161 = arith.mulf %156, %158 : vector<2x32xf32>
    %162 = arith.addf %160, %161 : vector<2x32xf32>
    %163 = math.tanh %162 : vector<2x32xf32>
    %164 = arith.mulf %159, %163 : vector<2x32xf32>
    %165 = vector.extract_strided_slice %5 {offsets = [8, 0], sizes = [2, 128], strides = [1, 1]} : vector<16x128xf32> to vector<2x128xf32>
    %cst_38 = arith.constant dense<0.000000e+00> : vector<2x128xf32>
    %166 = tpu.matmul %145, %6, %cst_38 {dimension_numbers = #tpu.dot_dimension_numbers<[1], [0], [0], [1], [0, 0, 1, 1], [], []>} : vector<2x32xf32>, vector<32x128xf32>, vector<2x128xf32> -> vector<2x128xf32>
    %167 = arith.addf %165, %166 : vector<2x128xf32>
    %168 = arith.negf %167 : vector<2x128xf32>
    %169 = math.exp %168 : vector<2x128xf32>
    %cst_39 = arith.constant 1.000000e+00 : f32
    %170 = vector.broadcast %cst_39 : f32 to vector<2x128xf32>
    %171 = arith.addf %170, %169 : vector<2x128xf32>
    %172 = arith.divf %170, %171 : vector<2x128xf32>
    %173 = math.tanh %167 : vector<2x128xf32>
    %174 = vector.extract_strided_slice %172 {offsets = [0, 0], sizes = [2, 32], strides = [1, 1]} : vector<2x128xf32> to vector<2x32xf32>
    %175 = vector.extract_strided_slice %172 {offsets = [0, 32], sizes = [2, 32], strides = [1, 1]} : vector<2x128xf32> to vector<2x32xf32>
    %176 = vector.extract_strided_slice %173 {offsets = [0, 64], sizes = [2, 32], strides = [1, 1]} : vector<2x128xf32> to vector<2x32xf32>
    %177 = vector.extract_strided_slice %172 {offsets = [0, 96], sizes = [2, 32], strides = [1, 1]} : vector<2x128xf32> to vector<2x32xf32>
    %178 = arith.mulf %175, %143 : vector<2x32xf32>
    %179 = arith.mulf %174, %176 : vector<2x32xf32>
    %180 = arith.addf %178, %179 : vector<2x32xf32>
    %181 = math.tanh %180 : vector<2x32xf32>
    %182 = arith.mulf %177, %181 : vector<2x32xf32>
    %183 = tpu.concatenate %182, %164 in 1 : vector<2x32xf32>, vector<2x32xf32> -> vector<2x64xf32>
    %cst_40 = arith.constant dense<0.000000e+00> : vector<2x128xf32>
    %184 = tpu.matmul %183, %7, %cst_40 {dimension_numbers = #tpu.dot_dimension_numbers<[1], [0], [0], [1], [0, 0, 1, 1], [], []>} : vector<2x64xf32>, vector<64x128xf32>, vector<2x128xf32> -> vector<2x128xf32>
    %185 = vector.broadcast %8 : vector<1x128xf32> to vector<2x128xf32>
    %186 = arith.addf %184, %185 : vector<2x128xf32>
    %187 = arith.negf %186 : vector<2x128xf32>
    %188 = math.exp %187 : vector<2x128xf32>
    %cst_41 = arith.constant 1.000000e+00 : f32
    %189 = vector.broadcast %cst_41 : f32 to vector<2x128xf32>
    %190 = arith.addf %189, %188 : vector<2x128xf32>
    %191 = arith.divf %189, %190 : vector<2x128xf32>
    %192 = math.tanh %186 : vector<2x128xf32>
    %193 = vector.extract_strided_slice %191 {offsets = [0, 0], sizes = [2, 32], strides = [1, 1]} : vector<2x128xf32> to vector<2x32xf32>
    %194 = vector.extract_strided_slice %191 {offsets = [0, 32], sizes = [2, 32], strides = [1, 1]} : vector<2x128xf32> to vector<2x32xf32>
    %195 = vector.extract_strided_slice %192 {offsets = [0, 64], sizes = [2, 32], strides = [1, 1]} : vector<2x128xf32> to vector<2x32xf32>
    %196 = vector.extract_strided_slice %191 {offsets = [0, 96], sizes = [2, 32], strides = [1, 1]} : vector<2x128xf32> to vector<2x32xf32>
    %197 = arith.mulf %194, %162 : vector<2x32xf32>
    %198 = arith.mulf %193, %195 : vector<2x32xf32>
    %199 = arith.addf %197, %198 : vector<2x32xf32>
    %200 = math.tanh %199 : vector<2x32xf32>
    %201 = arith.mulf %196, %200 : vector<2x32xf32>
    %202 = vector.extract_strided_slice %5 {offsets = [10, 0], sizes = [2, 128], strides = [1, 1]} : vector<16x128xf32> to vector<2x128xf32>
    %cst_42 = arith.constant dense<0.000000e+00> : vector<2x128xf32>
    %203 = tpu.matmul %182, %6, %cst_42 {dimension_numbers = #tpu.dot_dimension_numbers<[1], [0], [0], [1], [0, 0, 1, 1], [], []>} : vector<2x32xf32>, vector<32x128xf32>, vector<2x128xf32> -> vector<2x128xf32>
    %204 = arith.addf %202, %203 : vector<2x128xf32>
    %205 = arith.negf %204 : vector<2x128xf32>
    %206 = math.exp %205 : vector<2x128xf32>
    %cst_43 = arith.constant 1.000000e+00 : f32
    %207 = vector.broadcast %cst_43 : f32 to vector<2x128xf32>
    %208 = arith.addf %207, %206 : vector<2x128xf32>
    %209 = arith.divf %207, %208 : vector<2x128xf32>
    %210 = math.tanh %204 : vector<2x128xf32>
    %211 = vector.extract_strided_slice %209 {offsets = [0, 0], sizes = [2, 32], strides = [1, 1]} : vector<2x128xf32> to vector<2x32xf32>
    %212 = vector.extract_strided_slice %209 {offsets = [0, 32], sizes = [2, 32], strides = [1, 1]} : vector<2x128xf32> to vector<2x32xf32>
    %213 = vector.extract_strided_slice %210 {offsets = [0, 64], sizes = [2, 32], strides = [1, 1]} : vector<2x128xf32> to vector<2x32xf32>
    %214 = vector.extract_strided_slice %209 {offsets = [0, 96], sizes = [2, 32], strides = [1, 1]} : vector<2x128xf32> to vector<2x32xf32>
    %215 = arith.mulf %212, %180 : vector<2x32xf32>
    %216 = arith.mulf %211, %213 : vector<2x32xf32>
    %217 = arith.addf %215, %216 : vector<2x32xf32>
    %218 = math.tanh %217 : vector<2x32xf32>
    %219 = arith.mulf %214, %218 : vector<2x32xf32>
    %220 = tpu.concatenate %219, %201 in 1 : vector<2x32xf32>, vector<2x32xf32> -> vector<2x64xf32>
    %cst_44 = arith.constant dense<0.000000e+00> : vector<2x128xf32>
    %221 = tpu.matmul %220, %7, %cst_44 {dimension_numbers = #tpu.dot_dimension_numbers<[1], [0], [0], [1], [0, 0, 1, 1], [], []>} : vector<2x64xf32>, vector<64x128xf32>, vector<2x128xf32> -> vector<2x128xf32>
    %222 = vector.broadcast %8 : vector<1x128xf32> to vector<2x128xf32>
    %223 = arith.addf %221, %222 : vector<2x128xf32>
    %224 = arith.negf %223 : vector<2x128xf32>
    %225 = math.exp %224 : vector<2x128xf32>
    %cst_45 = arith.constant 1.000000e+00 : f32
    %226 = vector.broadcast %cst_45 : f32 to vector<2x128xf32>
    %227 = arith.addf %226, %225 : vector<2x128xf32>
    %228 = arith.divf %226, %227 : vector<2x128xf32>
    %229 = math.tanh %223 : vector<2x128xf32>
    %230 = vector.extract_strided_slice %228 {offsets = [0, 0], sizes = [2, 32], strides = [1, 1]} : vector<2x128xf32> to vector<2x32xf32>
    %231 = vector.extract_strided_slice %228 {offsets = [0, 32], sizes = [2, 32], strides = [1, 1]} : vector<2x128xf32> to vector<2x32xf32>
    %232 = vector.extract_strided_slice %229 {offsets = [0, 64], sizes = [2, 32], strides = [1, 1]} : vector<2x128xf32> to vector<2x32xf32>
    %233 = vector.extract_strided_slice %228 {offsets = [0, 96], sizes = [2, 32], strides = [1, 1]} : vector<2x128xf32> to vector<2x32xf32>
    %234 = arith.mulf %231, %199 : vector<2x32xf32>
    %235 = arith.mulf %230, %232 : vector<2x32xf32>
    %236 = arith.addf %234, %235 : vector<2x32xf32>
    %237 = math.tanh %236 : vector<2x32xf32>
    %238 = arith.mulf %233, %237 : vector<2x32xf32>
    %239 = vector.extract_strided_slice %5 {offsets = [12, 0], sizes = [2, 128], strides = [1, 1]} : vector<16x128xf32> to vector<2x128xf32>
    %cst_46 = arith.constant dense<0.000000e+00> : vector<2x128xf32>
    %240 = tpu.matmul %219, %6, %cst_46 {dimension_numbers = #tpu.dot_dimension_numbers<[1], [0], [0], [1], [0, 0, 1, 1], [], []>} : vector<2x32xf32>, vector<32x128xf32>, vector<2x128xf32> -> vector<2x128xf32>
    %241 = arith.addf %239, %240 : vector<2x128xf32>
    %242 = arith.negf %241 : vector<2x128xf32>
    %243 = math.exp %242 : vector<2x128xf32>
    %cst_47 = arith.constant 1.000000e+00 : f32
    %244 = vector.broadcast %cst_47 : f32 to vector<2x128xf32>
    %245 = arith.addf %244, %243 : vector<2x128xf32>
    %246 = arith.divf %244, %245 : vector<2x128xf32>
    %247 = math.tanh %241 : vector<2x128xf32>
    %248 = vector.extract_strided_slice %246 {offsets = [0, 0], sizes = [2, 32], strides = [1, 1]} : vector<2x128xf32> to vector<2x32xf32>
    %249 = vector.extract_strided_slice %246 {offsets = [0, 32], sizes = [2, 32], strides = [1, 1]} : vector<2x128xf32> to vector<2x32xf32>
    %250 = vector.extract_strided_slice %247 {offsets = [0, 64], sizes = [2, 32], strides = [1, 1]} : vector<2x128xf32> to vector<2x32xf32>
    %251 = vector.extract_strided_slice %246 {offsets = [0, 96], sizes = [2, 32], strides = [1, 1]} : vector<2x128xf32> to vector<2x32xf32>
    %252 = arith.mulf %249, %217 : vector<2x32xf32>
    %253 = arith.mulf %248, %250 : vector<2x32xf32>
    %254 = arith.addf %252, %253 : vector<2x32xf32>
    %255 = math.tanh %254 : vector<2x32xf32>
    %256 = arith.mulf %251, %255 : vector<2x32xf32>
    %257 = tpu.concatenate %256, %238 in 1 : vector<2x32xf32>, vector<2x32xf32> -> vector<2x64xf32>
    %cst_48 = arith.constant dense<0.000000e+00> : vector<2x128xf32>
    %258 = tpu.matmul %257, %7, %cst_48 {dimension_numbers = #tpu.dot_dimension_numbers<[1], [0], [0], [1], [0, 0, 1, 1], [], []>} : vector<2x64xf32>, vector<64x128xf32>, vector<2x128xf32> -> vector<2x128xf32>
    %259 = vector.broadcast %8 : vector<1x128xf32> to vector<2x128xf32>
    %260 = arith.addf %258, %259 : vector<2x128xf32>
    %261 = arith.negf %260 : vector<2x128xf32>
    %262 = math.exp %261 : vector<2x128xf32>
    %cst_49 = arith.constant 1.000000e+00 : f32
    %263 = vector.broadcast %cst_49 : f32 to vector<2x128xf32>
    %264 = arith.addf %263, %262 : vector<2x128xf32>
    %265 = arith.divf %263, %264 : vector<2x128xf32>
    %266 = math.tanh %260 : vector<2x128xf32>
    %267 = vector.extract_strided_slice %265 {offsets = [0, 0], sizes = [2, 32], strides = [1, 1]} : vector<2x128xf32> to vector<2x32xf32>
    %268 = vector.extract_strided_slice %265 {offsets = [0, 32], sizes = [2, 32], strides = [1, 1]} : vector<2x128xf32> to vector<2x32xf32>
    %269 = vector.extract_strided_slice %266 {offsets = [0, 64], sizes = [2, 32], strides = [1, 1]} : vector<2x128xf32> to vector<2x32xf32>
    %270 = vector.extract_strided_slice %265 {offsets = [0, 96], sizes = [2, 32], strides = [1, 1]} : vector<2x128xf32> to vector<2x32xf32>
    %271 = arith.mulf %268, %236 : vector<2x32xf32>
    %272 = arith.mulf %267, %269 : vector<2x32xf32>
    %273 = arith.addf %271, %272 : vector<2x32xf32>
    %274 = math.tanh %273 : vector<2x32xf32>
    %275 = arith.mulf %270, %274 : vector<2x32xf32>
    %276 = vector.extract_strided_slice %5 {offsets = [14, 0], sizes = [2, 128], strides = [1, 1]} : vector<16x128xf32> to vector<2x128xf32>
    %cst_50 = arith.constant dense<0.000000e+00> : vector<2x128xf32>
    %277 = tpu.matmul %256, %6, %cst_50 {dimension_numbers = #tpu.dot_dimension_numbers<[1], [0], [0], [1], [0, 0, 1, 1], [], []>} : vector<2x32xf32>, vector<32x128xf32>, vector<2x128xf32> -> vector<2x128xf32>
    %278 = arith.addf %276, %277 : vector<2x128xf32>
    %279 = arith.negf %278 : vector<2x128xf32>
    %280 = math.exp %279 : vector<2x128xf32>
    %cst_51 = arith.constant 1.000000e+00 : f32
    %281 = vector.broadcast %cst_51 : f32 to vector<2x128xf32>
    %282 = arith.addf %281, %280 : vector<2x128xf32>
    %283 = arith.divf %281, %282 : vector<2x128xf32>
    %284 = math.tanh %278 : vector<2x128xf32>
    %285 = vector.extract_strided_slice %283 {offsets = [0, 0], sizes = [2, 32], strides = [1, 1]} : vector<2x128xf32> to vector<2x32xf32>
    %286 = vector.extract_strided_slice %283 {offsets = [0, 32], sizes = [2, 32], strides = [1, 1]} : vector<2x128xf32> to vector<2x32xf32>
    %287 = vector.extract_strided_slice %284 {offsets = [0, 64], sizes = [2, 32], strides = [1, 1]} : vector<2x128xf32> to vector<2x32xf32>
    %288 = vector.extract_strided_slice %283 {offsets = [0, 96], sizes = [2, 32], strides = [1, 1]} : vector<2x128xf32> to vector<2x32xf32>
    %289 = arith.mulf %286, %254 : vector<2x32xf32>
    %290 = arith.mulf %285, %287 : vector<2x32xf32>
    %291 = arith.addf %289, %290 : vector<2x32xf32>
    %292 = math.tanh %291 : vector<2x32xf32>
    %293 = arith.mulf %288, %292 : vector<2x32xf32>
    %294 = tpu.concatenate %293, %275 in 1 : vector<2x32xf32>, vector<2x32xf32> -> vector<2x64xf32>
    %cst_52 = arith.constant dense<0.000000e+00> : vector<2x128xf32>
    %295 = tpu.matmul %294, %7, %cst_52 {dimension_numbers = #tpu.dot_dimension_numbers<[1], [0], [0], [1], [0, 0, 1, 1], [], []>} : vector<2x64xf32>, vector<64x128xf32>, vector<2x128xf32> -> vector<2x128xf32>
    %296 = vector.broadcast %8 : vector<1x128xf32> to vector<2x128xf32>
    %297 = arith.addf %295, %296 : vector<2x128xf32>
    %298 = arith.negf %297 : vector<2x128xf32>
    %299 = math.exp %298 : vector<2x128xf32>
    %cst_53 = arith.constant 1.000000e+00 : f32
    %300 = vector.broadcast %cst_53 : f32 to vector<2x128xf32>
    %301 = arith.addf %300, %299 : vector<2x128xf32>
    %302 = arith.divf %300, %301 : vector<2x128xf32>
    %303 = math.tanh %297 : vector<2x128xf32>
    %304 = vector.extract_strided_slice %302 {offsets = [0, 0], sizes = [2, 32], strides = [1, 1]} : vector<2x128xf32> to vector<2x32xf32>
    %305 = vector.extract_strided_slice %302 {offsets = [0, 32], sizes = [2, 32], strides = [1, 1]} : vector<2x128xf32> to vector<2x32xf32>
    %306 = vector.extract_strided_slice %303 {offsets = [0, 64], sizes = [2, 32], strides = [1, 1]} : vector<2x128xf32> to vector<2x32xf32>
    %307 = vector.extract_strided_slice %302 {offsets = [0, 96], sizes = [2, 32], strides = [1, 1]} : vector<2x128xf32> to vector<2x32xf32>
    %308 = arith.mulf %305, %273 : vector<2x32xf32>
    %309 = arith.mulf %304, %306 : vector<2x32xf32>
    %310 = arith.addf %308, %309 : vector<2x32xf32>
    %311 = math.tanh %310 : vector<2x32xf32>
    %312 = arith.mulf %307, %311 : vector<2x32xf32>
    %313 = tpu.concatenate %53, %90, %127, %164, %201, %238, %275, %312 in 0 : vector<2x32xf32>, vector<2x32xf32>, vector<2x32xf32>, vector<2x32xf32>, vector<2x32xf32>, vector<2x32xf32>, vector<2x32xf32>, vector<2x32xf32> -> vector<16x32xf32>
    %c0_54 = arith.constant 0 : index
    %c0_55 = arith.constant 0 : index
    %314 = vector.load %arg6[%c0_54, %c0_55] : memref<32x128xf32, #tpu.memory_space<vmem>>, vector<32x128xf32>
    %cst_56 = arith.constant dense<0.000000e+00> : vector<16x128xf32>
    %315 = tpu.matmul %313, %314, %cst_56 {dimension_numbers = #tpu.dot_dimension_numbers<[1], [0], [0], [1], [0, 0, 1, 1], [], []>} : vector<16x32xf32>, vector<32x128xf32>, vector<16x128xf32> -> vector<16x128xf32>
    %c0_57 = arith.constant 0 : index
    %c0_58 = arith.constant 0 : index
    %316 = vector.load %arg7[%c0_57, %c0_58] : memref<1x128xf32, #tpu.memory_space<vmem>>, vector<1x128xf32>
    %317 = vector.broadcast %316 : vector<1x128xf32> to vector<16x128xf32>
    %318 = arith.addf %315, %317 : vector<16x128xf32>
    %cst_59 = arith.constant dense<0xFF800000> : vector<16xf32>
    %319 = vector.multi_reduction <maximumf>, %318, %cst_59 [1] : vector<16x128xf32> to vector<16xf32>
    %320 = vector.shape_cast %319 : vector<16xf32> to vector<16x1xf32>
    %321 = vector.broadcast %320 : vector<16x1xf32> to vector<16x128xf32>
    %322 = arith.subf %318, %321 : vector<16x128xf32>
    %323 = math.exp %322 : vector<16x128xf32>
    %cst_60 = arith.constant dense<0.000000e+00> : vector<16xf32>
    %324 = vector.multi_reduction <add>, %323, %cst_60 [1] : vector<16x128xf32> to vector<16xf32>
    %325 = vector.shape_cast %324 : vector<16xf32> to vector<16x1xf32>
    %326 = math.log %325 : vector<16x1xf32>
    %327 = arith.addf %320, %326 : vector<16x1xf32>
    %328 = vector.broadcast %327 : vector<16x1xf32> to vector<16x128xf32>
    %329 = arith.subf %318, %328 : vector<16x128xf32>
    %c0_61 = arith.constant 0 : index
    %c0_62 = arith.constant 0 : index
    %330 = vector.load %arg10[%c0_61, %c0_62] : memref<16x128xf32, #tpu.memory_space<vmem>>, vector<16x128xf32>
    tpu.vector_store %arg10[%c0_61, %c0_62], %329 {strides = array<i32>} : memref<16x128xf32, #tpu.memory_space<vmem>>, vector<16x128xf32>,
    %c0_63 = arith.constant 0 : index
    %c0_64 = arith.constant 0 : index
    %c0_65 = arith.constant 0 : index
    %331 = vector.load %arg11[%c0_63, %c0_64, %c0_65] : memref<2x2x32xf32, #tpu.memory_space<vmem>>, vector<1x2x32xf32>
    %332 = vector.shape_cast %331 : vector<1x2x32xf32> to vector<2x32xf32>
    %333 = vector.shape_cast %293 : vector<2x32xf32> to vector<1x2x32xf32>
    tpu.vector_store %arg11[%c0_63, %c0_64, %c0_65], %333 {strides = array<i32>} : memref<2x2x32xf32, #tpu.memory_space<vmem>>, vector<1x2x32xf32>,
    %c1_66 = arith.constant 1 : index
    %c0_67 = arith.constant 0 : index
    %c0_68 = arith.constant 0 : index
    %334 = vector.load %arg11[%c1_66, %c0_67, %c0_68] : memref<2x2x32xf32, #tpu.memory_space<vmem>>, vector<1x2x32xf32>
    %335 = vector.shape_cast %334 : vector<1x2x32xf32> to vector<2x32xf32>
    %336 = vector.shape_cast %312 : vector<2x32xf32> to vector<1x2x32xf32>
    tpu.vector_store %arg11[%c1_66, %c0_67, %c0_68], %336 {strides = array<i32>} : memref<2x2x32xf32, #tpu.memory_space<vmem>>, vector<1x2x32xf32>,
    %c0_69 = arith.constant 0 : index
    %c0_70 = arith.constant 0 : index
    %c0_71 = arith.constant 0 : index
    %337 = vector.load %arg12[%c0_69, %c0_70, %c0_71] : memref<2x2x32xf32, #tpu.memory_space<vmem>>, vector<1x2x32xf32>
    %338 = vector.shape_cast %337 : vector<1x2x32xf32> to vector<2x32xf32>
    %339 = vector.shape_cast %291 : vector<2x32xf32> to vector<1x2x32xf32>
    tpu.vector_store %arg12[%c0_69, %c0_70, %c0_71], %339 {strides = array<i32>} : memref<2x2x32xf32, #tpu.memory_space<vmem>>, vector<1x2x32xf32>,
    %c1_72 = arith.constant 1 : index
    %c0_73 = arith.constant 0 : index
    %c0_74 = arith.constant 0 : index
    %340 = vector.load %arg12[%c1_72, %c0_73, %c0_74] : memref<2x2x32xf32, #tpu.memory_space<vmem>>, vector<1x2x32xf32>
    %341 = vector.shape_cast %340 : vector<1x2x32xf32> to vector<2x32xf32>
    %342 = vector.shape_cast %310 : vector<2x32xf32> to vector<1x2x32xf32>
    tpu.vector_store %arg12[%c1_72, %c0_73, %c0_74], %342 {strides = array<i32>} : memref<2x2x32xf32, #tpu.memory_space<vmem>>, vector<1x2x32xf32>,
    return
  }
}

</mosaic_0001>

<bundles_post_ra>
// kernel: lstm_chord_forward.1
= control target key start
LH: loop header
LB: loop body
LE: loop exit
PB: predicated region body
PF: predicated region fallthrough
CT: control target
= control target key end

     0   :  { %18 = vsyncpa [#allocation3], 0  ;;  %v3099_v3 = vmov 0.0|0.0   ;;  %vm114_vm0 = vcmask 662528   ;;  %s3877_s0 = inlined_call_operand.vmem [shape: f32[16,465], index: 0, kind: input, shape index: {}]   ;;  %s3878_s1 = inlined_call_operand.vmem [shape: f32[465,128], index: 1, kind: input, shape index: {}]   ;;  %s3879_s2 = inlined_call_operand.vmem [shape: f32[1,128], index: 2, kind: input, shape index: {}]   ;;  %s3880_s3 = inlined_call_operand.vmem [shape: f32[32,128], index: 3, kind: input, shape index: {}]   ;;  %s3881_s4 = inlined_call_operand.vmem [shape: f32[64,128], index: 4, kind: input, shape index: {}]   ;;  %s3882_s5 = inlined_call_operand.vmem [shape: f32[1,128], index: 5, kind: input, shape index: {}]   ;;  %s3883_s6 = inlined_call_operand.vmem [shape: f32[32,128], index: 6, kind: input, shape index: {}]   ;;  %s3884_s7 = inlined_call_operand.vmem [shape: f32[1,128], index: 7, kind: input, shape index: {}]   ;;  %s3885_s8 = inlined_call_operand.vmem [shape: f32[2,2,32], index: 8, kind: input, shape index: {}, may-alias: {8,9}]   ;;  %s3886_s9 = inlined_call_operand.vmem [shape: f32[2,2,32], index: 9, kind: input, shape index: {}, may-alias: {8,9}]   ;;  %s3887_s10 = inlined_call_operand.hbm [shape: f32[16,128], index: 10, kind: output, shape index: {0}]   ;;  %s3888_s11 = inlined_call_operand.hbm [shape: f32[2,2,32], index: 11, kind: output, shape index: {1}]   ;;  %s3889_s12 = inlined_call_operand.hbm [shape: f32[2,2,32], index: 12, kind: output, shape index: {2}]  }
   0x1   :  { %v80_v0 = vld [vmem:[%s3878_s1 + $0x100] sm:$0xff]  ;;  %v81_v1 = vld [vmem:[%s3878_s1 + $0x108] sm:$0xff]  ;;  %v82_v2 = vld [vmem:[%s3878_s1 + $0x110] sm:$0xff]  ;;  %2690 = vmatprep.subr.bf16.mxu1 %v3099_v3 }
   0x2   :  { %v2691_v4 = vpack.c.bf16 %v81_v1, %v80_v0  ;;  %v83_v5 = vld [vmem:[%s3878_s1 + $0x118] sm:$0xff]  ;;  %v64_v6 = vld [vmem:[%s3878_s1 + $0x80] sm:$0xff]  ;;  %v65_v8 = vld [vmem:[%s3878_s1 + $0x88] sm:$0xff] }
   0x3   :  { %v2694_v7 = vpack.c.bf16 %v83_v5, %v82_v2  ;;  %v48_v9 = vld [vmem:[%s3878_s1] sm:$0xff]  ;;  %v49_v10 = vld [vmem:[%s3878_s1 + $0x8] sm:$0xff]  ;;  %v2658_v13 = vpack.c.bf16 %v65_v8, %v64_v6  ;;  %v66_v15 = vld [vmem:[%s3878_s1 + $0x90] sm:$0xff] }
   0x4   :  { %2692 = vmatpush1.bf16.msra.mxu1 %v2691_v4  ;;  %v84_v11 = vld [vmem:[%s3878_s1 + $0x120] sm:$0xff]  ;;  %v85_v12 = vld [vmem:[%s3878_s1 + $0x128] sm:$0xff]  ;;  %v2660_v14 = vpack.c.bf16 %v49_v10, %v48_v9  ;;  %v67_v16 = vld [vmem:[%s3878_s1 + $0x98] sm:$0xff] }
   0x5   :  { %2693 = vmatprep.subr.bf16.mxu1 %v3099_v3  ;;  %v50_v17 = vld [vmem:[%s3878_s1 + $0x10] sm:$0xff]  ;;  %v51_v18 = vld [vmem:[%s3878_s1 + $0x18] sm:$0xff]  ;;  %2659 = vmatprep.subr.bf16.mxu0 %v2658_v13  ;;  %v2662_v19 = vpack.c.bf16 %v67_v16, %v66_v15  ;;  %v68_v20 = vld [vmem:[%s3878_s1 + $0xa0] sm:$0xff]  ;;  %v2697_v21 = vpack.c.bf16 %v85_v12, %v84_v11 }
   0x6   :  { %v86_v22 = vld [vmem:[%s3878_s1 + $0x130] sm:$0xff]  ;;  %2661 = vmatpush3.bf16.msra.mxu0 %v2660_v14  ;;  %v2664_v23 = vpack.c.bf16 %v51_v18, %v50_v17  ;;  %v69_v24 = vld [vmem:[%s3878_s1 + $0xa8] sm:$0xff]  ;;  %v87_v25 = vld [vmem:[%s3878_s1 + $0x138] sm:$0xff] }
   0x7   :  { %2663 = vmatprep.subr.bf16.mxu0 %v2662_v19  ;;  %v2666_v26 = vpack.c.bf16 %v69_v24, %v68_v20  ;;  %v52_v27 = vld [vmem:[%s3878_s1 + $0x20] sm:$0xff]  ;;  %v53_v28 = vld [vmem:[%s3878_s1 + $0x28] sm:$0xff]  ;;  %v70_v29 = vld [vmem:[%s3878_s1 + $0xb0] sm:$0xff]  ;;  %v2700_v31 = vpack.c.bf16 %v87_v25, %v86_v22 }
   0x8   :  { %2695 = vmatpush1.bf16.msra.mxu1 %v2694_v7  ;;  %v71_v30 = vld [vmem:[%s3878_s1 + $0xb8] sm:$0xff]  ;;  %v88_v32 = vld [vmem:[%s3878_s1 + $0x140] sm:$0xff]  ;;  %v2668_v33 = vpack.c.bf16 %v53_v28, %v52_v27  ;;  %v89_v34 = vld [vmem:[%s3878_s1 + $0x148] sm:$0xff] }
   0x9   :  { %2696 = vmatprep.subr.bf16.mxu1 %v3099_v3  ;;  %v2670_v35 = vpack.c.bf16 %v71_v30, %v70_v29  ;;  %v54_v36 = vld [vmem:[%s3878_s1 + $0x30] sm:$0xff]  ;;  %v55_v37 = vld [vmem:[%s3878_s1 + $0x38] sm:$0xff]  ;;  %v72_v38 = vld [vmem:[%s3878_s1 + $0xc0] sm:$0xff]  ;;  %v2703_v40 = vpack.c.bf16 %v89_v34, %v88_v32 }
   0xa   :  { %2665 = vmatpush3.bf16.msra.mxu0 %v2664_v23  ;;  %v73_v39 = vld [vmem:[%s3878_s1 + $0xc8] sm:$0xff]  ;;  %v90_v41 = vld [vmem:[%s3878_s1 + $0x150] sm:$0xff]  ;;  %v2672_v42 = vpack.c.bf16 %v55_v37, %v54_v36  ;;  %v91_v43 = vld [vmem:[%s3878_s1 + $0x158] sm:$0xff] }
   0xb   :  { %2667 = vmatprep.subr.bf16.mxu0 %v2666_v26  ;;  %v2674_v44 = vpack.c.bf16 %v73_v39, %v72_v38  ;;  %v56_v45 = vld [vmem:[%s3878_s1 + $0x40] sm:$0xff]  ;;  %v57_v46 = vld [vmem:[%s3878_s1 + $0x48] sm:$0xff]  ;;  %v74_v47 = vld [vmem:[%s3878_s1 + $0xd0] sm:$0xff]  ;;  %v2706_v50 = vpack.c.bf16 %v91_v43, %v90_v41 }
   0xc   :  { %2698 = vmatpush1.bf16.msra.mxu1 %v2697_v21  ;;  %v75_v48 = vld [vmem:[%s3878_s1 + $0xd8] sm:$0xff]  ;;  %v41_v49 = vld [vmem:[%s3877_s0 + $0x8] sm:$0xff]  ;;  %v92_v51 = vld [vmem:[%s3878_s1 + $0x160] sm:$0xff]  ;;  %v2676_v52 = vpack.c.bf16 %v57_v46, %v56_v45 }
   0xd   :  { %2699 = vmatprep.subr.bf16.mxu1 %v3099_v3  ;;  %v93_v53 = vld [vmem:[%s3878_s1 + $0x168] sm:$0xff]  ;;  %v2678_v54 = vpack.c.bf16 %v75_v48, %v74_v47  ;;  %v58_v55 = vld [vmem:[%s3878_s1 + $0x50] sm:$0xff]  ;;  %v59_v56 = vld [vmem:[%s3878_s1 + $0x58] sm:$0xff]  ;;  %189 = vmatprep.mubr.f32.mxu0 %v41_v49 }
   0xe   :  { %2669 = vmatpush3.bf16.msra.mxu0 %v2668_v33  ;;  %v76_v57 = vld [vmem:[%s3878_s1 + $0xe0] sm:$0xff]  ;;  %v77_v58 = vld [vmem:[%s3878_s1 + $0xe8] sm:$0xff]  ;;  %v43_v59 = vld [vmem:[%s3877_s0 + $0x18] sm:$0xff]  ;;  %v2709_v60 = vpack.c.bf16 %v93_v53, %v92_v51  ;;  %v2680_v63 = vpack.c.bf16 %v59_v56, %v58_v55 }
   0xf   :  { %2671 = vmatprep.subr.bf16.mxu0 %v2670_v35  ;;  %v94_v61 = vld [vmem:[%s3878_s1 + $0x170] sm:$0xff]  ;;  %v95_v62 = vld [vmem:[%s3878_s1 + $0x178] sm:$0xff]  ;;  %v2682_v0 = vpack.c.bf16 %v77_v58, %v76_v57  ;;  %v60_v1 = vld [vmem:[%s3878_s1 + $0x60] sm:$0xff] }
  0x10   :  { %2701 = vmatpush1.bf16.msra.mxu1 %v2700_v31  ;;  %v61_v2 = vld [vmem:[%s3878_s1 + $0x68] sm:$0xff] }
  0x11   :  { %2702 = vmatprep.subr.bf16.mxu1 %v3099_v3 }
  0x12   :  { %2673 = vmatpush3.bf16.msra.mxu0 %v2672_v42 }
  0x13   :  { %2675 = vmatprep.subr.bf16.mxu0 %v2674_v44 }
  0x14   :  { %2704 = vmatpush1.bf16.msra.mxu1 %v2703_v40 }
  0x15   :  { %2705 = vmatprep.subr.bf16.mxu1 %v3099_v3 }
  0x16   :  { %2677 = vmatpush3.bf16.msra.mxu0 %v2676_v52 }
  0x17   :  { %2679 = vmatprep.subr.bf16.mxu0 %v2678_v54 }
  0x18   :  { %2707 = vmatpush1.bf16.msra.mxu1 %v2706_v50 }
  0x19   :  { %2708 = vmatprep.subr.bf16.mxu1 %v3099_v3 }
  0x1a   :  { %19 = vsyncpa [#allocation5], 0  ;;  %v78_v4 = vld [vmem:[%s3878_s1 + $0xf0] sm:$0xff]  ;;  %v79_v5 = vld [vmem:[%s3878_s1 + $0xf8] sm:$0xff]  ;;  %2211 = vmatprep.mubr.msk.f32.mxu1 %vm114_vm0, %v43_v59  ;;  %v2712_v6 = vpack.c.bf16 %v95_v62, %v94_v61  ;;  %2681 = vmatpush3.bf16.msra.mxu0 %v2680_v63  ;;  %v2684_v8 = vpack.c.bf16 %v61_v2, %v60_v1  ;;  %vm294_vm1 = vcmask 261120   ;;  %vm3100_vm2 = vmmov 0  }
  0x1b   :  { %v96_v7 = vld [vmem:[%s3878_s1 + $0x180] sm:$0xff]  ;;  %v97_v9 = vld [vmem:[%s3878_s1 + $0x188] sm:$0xff]  ;;  %2683 = vmatprep.subr.bf16.mxu0 %v2682_v0  ;;  %v2686_v10 = vpack.c.bf16 %v79_v5, %v78_v4  ;;  %v62_v11 = vld [vmem:[%s3878_s1 + $0x70] sm:$0xff]  ;;  %v3101_v36 = vmov 0.0   ;;  %vm121_vm3 = vcmask 1040384   ;;  %s3102_s20 = smov 64  }
  0x1c   :  { %2710 = vmatpush1.bf16.msra.mxu1 %v2709_v60  ;;  %v63_v12 = vld [vmem:[%s3878_s1 + $0x78] sm:$0xff]  ;;  %v2715_v13 = vpack.c.bf16 %v97_v9, %v96_v7  ;;  %v98_v14 = vld [vmem:[%s3878_s1 + $0x190] sm:$0xff]  ;;  %v275_v17 = vld [vmem:[%s3880_s3] sm:$0xff]  ;;  %s3103_s22 = smov 32   ;;  %vm412_vm4 = vcmask 523264   ;;  %vm2014_vm5 = vcmask 1041408  }
  0x1d   :  { %2711 = vmatprep.subr.bf16.mxu1 %v3099_v3  ;;  %v2688_v15 = vpack.c.bf16 %v63_v12, %v62_v11  ;;  %v99_v16 = vld [vmem:[%s3878_s1 + $0x198] sm:$0xff]  ;;  %v276_v18 = vld [vmem:[%s3880_s3 + $0x8] sm:$0xff]  ;;  %v100_v20 = vld [vmem:[%s3878_s1 + $0x1a0] sm:$0xff]  ;;  %vm2016_vm6 = vcmask 1043456   ;;  %vm2018_vm7 = vcmask 1045504   ;;  %vm2143_vm8 = vcmask 261126  }
  0x1e   :  { %2685 = vmatpush3.bf16.msra.mxu0 %v2684_v8  ;;  %v2718_v19 = vpack.c.bf16 %v99_v16, %v98_v14  ;;  %v40_v21 = vld [vmem:[%s3877_s0] sm:$0xff]  ;;  %v3360_v22 = vpack.c.bf16 %v276_v18, %v275_v17  ;;  %v101_v23 = vld [vmem:[%s3878_s1 + $0x1a8] sm:$0xff]  ;;  %v277_v24 = vld [vmem:[%s3880_s3 + $0x10] sm:$0xff]  ;;  %vm2149_vm9 = vcmask 254976   ;;  %s3106_s30 = smov [#allocation6]  }
  0x1f   :  { %2687 = vmatprep.subr.bf16.mxu0 %v2686_v10  ;;  %v278_v25 = vld [vmem:[%s3880_s3 + $0x18] sm:$0xff]  ;;  %v45_v26 = vld [vmem:[%s3877_s0 + $0x28] sm:$0xff]  ;;  %v2721_v27 = vpack.c.bf16 %v101_v23, %v100_v20  ;;  %v44_v28 = vld [vmem:[%s3877_s0 + $0x20] sm:$0xff]  ;;  %s2191_s13 = sshll.u32 %s3106_s30, 4  ;;  %s3825_s13 = int_to_ptr.vmem [resolvable:$true] %s2191_s13 }
  0x20   :  { %2713 = vmatpush1.bf16.msra.mxu1 %v2712_v6  ;;  %v3380_v29 = vpack.c.bf16 %v278_v25, %v277_v24  ;;  %v102_v30 = vld [vmem:[%s3878_s1 + $0x1b0] sm:$0xff]  ;;  %v103_v31 = vld [vmem:[%s3878_s1 + $0x1b8] sm:$0xff]  ;;  %v288_v33 = vld [vmem:[%s3885_s8] sm:$0x3] }
  0x21   :  { %2714 = vmatprep.subr.bf16.mxu1 %v3099_v3  ;;  %v2724_v32 = vpack.c.bf16 %v103_v31, %v102_v30  ;;  %v104_v34 = vld [vmem:[%s3878_s1 + $0x1c0] sm:$0xff]  ;;  %v105_v35 = vld [vmem:[%s3878_s1 + $0x1c8] sm:$0xff]  ;;  %v106_v38 = vld [vmem:[%s3878_s1 + $0x1d0] sm:$0x1] }
  0x22   :  { %2689 = vmatpush3.bf16.msra.mxu0 %v2688_v15  ;;  %v2727_v37 = vpack.c.bf16 %v105_v35, %v104_v34  ;;  %v42_v39 = vld [vmem:[%s3877_s0 + $0x10] sm:$0xff]  ;;  %v47_v40 = vld [vmem:[%s3877_s0 + $0x38] sm:$0xff]  ;;  %v2209_v48 = vld [vmem:[%s3879_s2] ss:$0 sm:$0xff] }
  0x23   :  { %2729 = vmatprep.subr.bf16.mxu0 %v3099_v3  ;;  %v46_v41 = vld [vmem:[%s3877_s0 + $0x30] sm:$0xff]  ;;  %v289_v61 = vld [vmem:[%s3886_s9] sm:$0x3]  ;;  %v280_v10 = vld [vmem:[%s3881_s4 + $0x8] sm:$0xff] }
  0x24   :  { %2716 = vmatpush1.bf16.msra.mxu1 %v2715_v13  ;;  %v279_v9 = vld [vmem:[%s3881_s4] sm:$0xff]  ;;  %v281_v11 = vld [vmem:[%s3881_s4 + $0x10] sm:$0xff]  ;;  %v282_v13 = vld [vmem:[%s3881_s4 + $0x18] sm:$0xff] }
  0x25   :  { %2717 = vmatprep.subr.bf16.mxu1 %v3099_v3  ;;  %190 = vmatmul.mubr.f32.vlgmr.msra.gmra.mrb[0].mxu0 %v40_v21  ;;  %v3455_v12 = vpack.c.bf16 %v280_v10, %v279_v9  ;;  %v3461_v14 = vpack.c.bf16 %v282_v13, %v281_v11  ;;  %v283_v15 = vld [vmem:[%s3881_s4 + $0x20] sm:$0xff]  ;;  %v284_v16 = vld [vmem:[%s3881_s4 + $0x28] sm:$0xff]  ;;  %v285_v18 = vld [vmem:[%s3881_s4 + $0x30] sm:$0xff] }
  0x26   :  { %2731 = vmatpush3.bf16.msra.mxu0 %v3360_v22  ;;  %194 = vmatprep.mubr.f32.mxu0 %v45_v26  ;;  %v3471_v17 = vpack.c.bf16 %v284_v16, %v283_v15  ;;  %v2213_v23 = vld [vmem:[%s3885_s8 + $0x2] sm:$0x3]  ;;  %v3514_v30 = vld [vmem:[%s3882_s5] ss:$0 sm:$0xff] }
  0x27   :  { %2732 = vmatprep.subr.bf16.mxu0 %v3099_v3 }
  0x28   :  { %2719 = vmatpush1.bf16.msra.mxu1 %v2718_v19  ;;  %v286_v19 = vld [vmem:[%s3881_s4 + $0x38] sm:$0xff] }
  0x29   :  { %2720 = vmatprep.subr.bf16.mxu1 %v3099_v3  ;;  %195 = vmatmul.mubr.f32.gmra.mrb[2].mxu0 %v44_v28  ;;  %v3482_v21 = vpack.c.bf16 %v286_v19, %v285_v18 }
  0x2a   :  { %2734 = vmatpush3.bf16.msra.mxu0 %v3380_v29  ;;  %2415 = vmatprep.mubr.msk.f32.mxu0 %vm3100_vm2, %v3101_v36 }
  0x2b   :  { %2735 = vmatprep.subr.bf16.mxu0 %v3099_v3 }
  0x2c   :  { %2722 = vmatpush1.bf16.msra.mxu1 %v2721_v27 }
  0x2d   :  { %2723 = vmatprep.subr.bf16.mxu1 %v3099_v3  ;;  %2416 = vmatmul.mubr.msk.f32.vlgmr.msra.gmra.mrb[4].mxu0 %vm294_vm1, %v288_v33 }
  0x2e   :  { %2434 = vmatprep.mubr.msk.f32.mxu0 %vm3100_vm2, %v3101_v36  ;;  %2737 = vmatpush3.bf16.msra.mxu0 %v3455_v12 }
  0x2f   :  { %2738 = vmatprep.subr.bf16.mxu0 %v3099_v3 }
  0x30   :  { %2725 = vmatpush1.bf16.msra.mxu1 %v2724_v32 }
  0x31   :  { %2726 = vmatprep.subr.bf16.mxu1 %v3099_v3 }
  0x32   :  { %2740 = vmatpush3.bf16.msra.mxu0 %v3461_v14 }
  0x33   :  { %2741 = vmatprep.subr.bf16.mxu0 %v3099_v3 }
  0x34   :  { %2728 = vmatpush1.bf16.msra.mxu1 %v2727_v37 }
  0x35   :  { %252 = vmatprep.subr.mxu1 %v3101_v36 }
  0x36   :  { %2743 = vmatpush3.bf16.msra.mxu0 %v3471_v17 }
  0x37   :  { %2744 = vmatprep.subr.bf16.mxu0 %v3099_v3 }
  0x38   :  { %2210 = vmatpush1.msk.msra.mxu1 %vm121_vm3, %v106_v38 }
  0x39   :  { %265 = vmatmul.mubr.f32.vlgmr.msra.gmra.mrb[0].mxu1 %v42_v39  ;;  %2747 = vmatprep.subr.bf16.mxu1 %v3099_v3 }
  0x3a   :  { %2212 = vmatprep.mubr.msk.f32.mxu1 %vm114_vm0, %v47_v40  ;;  %2749 = vmatpush3.bf16.msra.mxu1 %v3360_v22 }
  0x3b   :  { %2750 = vmatprep.subr.bf16.mxu1 %v3099_v3  ;;  %2746 = vmatpush3.bf16.msra.mxu0 %v3482_v21 }
  0x3c   :  { %2753 = vmatprep.subr.bf16.mxu0 %v3099_v3 }
  0x3d   :  { %270 = vmatmul.mubr.f32.gmra.mrb[2].mxu1 %v46_v41  ;;  %v2214_v41 = vld [vmem:[%s3886_s9 + $0x2] sm:$0x3] }
  0x3e   :  { %2752 = vmatpush3.bf16.msra.mxu1 %v3380_v29  ;;  %2445 = vmatprep.mubr.msk.f32.mxu1 %vm3100_vm2, %v3101_v36 }
  0x3f   :  { %2765 = vmatprep.subr.bf16.mxu1 %v3099_v3 }
  0xf8   :  { %v2283_v42 = vpop.f32.mrb[0].mxu0 }
  0xf9   :  { %v2284_v43 = vpop.f32.mrb[1].mxu0 }
  0xfa   :  { %v2285_v44 = vadd.f32 %v2284_v43, %v2283_v42 }
  0xfc   :  { %v2286_v45 = vpop.f32.mrb[2].mxu0  ;;  %v192_v52 = vadd.f32 %v2285_v44, %v2209_v48 }
  0xfd   :  { %v2287_v46 = vpop.f32.mrb[3].mxu0 }
  0xfe   :  { %v2288_v47 = vadd.f32 %v2287_v46, %v2286_v45 }
 0x100   :  { %v364_v49 = vpop.f32.mrb[4].mxu0  ;;  %v197_v50 = vadd.f32 %v2288_v47, %v2209_v48 }
 0x101   :  { %v2417_v51 = vpop.f32.mrb[5].mxu0 }
 0x10c   :  { %v266_v53 = vpop.f32.mrb[0].mxu1 }
 0x10d   :  { %v3432_v54 = vadd.f32 %v266_v53, %v192_v52  ;;  %v268_v55 = vpop.f32.mrb[1].mxu1 }
 0x10f   :  { %v368_v56 = vadd.f32 %v364_v49, %v3432_v54 }
 0x110   :  { %v271_v57 = vpop.f32.mrb[2].mxu1 }
 0x111   :  { %2893 = vtanh.f32 %v368_v56  ;;  %v3435_v58 = vadd.f32 %v271_v57, %v197_v50  ;;  %v273_v59 = vpop.f32.mrb[3].mxu1  ;;  %v2216_v62 = vmul.f32 -1.442695, %v368_v56 }
 0x113   :  { %2895 = vpow2.f32 %v2216_v62 }
 0x11b   :  { %v2894_v60 = vpop.eup %2893 }
 0x11c   :  { %382 = vrot.lane.b32.xlu0 %v2894_v60, %s3102_s20 }
 0x11d   :  { %v2896_v63 = vpop.eup %2895 }
 0x11e   :  { %v372_v0 = vadd.f32 1.0, %v2896_v63 }
 0x120   :  { %377 = vrot.lane.b32.xlu0 %v289_v61, %s3103_s22  ;;  %2897 = vrcp.f32 %v372_v0 }
 0x12a   :  { %v2898_v1 = vpop.eup %2897 }
 0x18e   :  { %v383_v2 = vpop.permute.xlu0 %382 }
 0x18f   :  { %v385_v4 = vmul.f32 %v2898_v1, %v383_v2 }
 0x191   :  { %387 = vrot.lane.b32.xlu1 %v385_v4, %s3103_s22 }
 0x192   :  { %v378_v5 = vpop.permute.xlu0 %377 }
 0x193   :  { %v380_v6 = vmul.f32 %v2898_v1, %v378_v5 }
 0x203   :  { %v388_v7 = vpop.permute.xlu1 %387 }
 0x204   :  { %v3443_v8 = vadd.f32 %v388_v7, %v380_v6 }
 0x206   :  { %2899 = vtanh.f32 %v3443_v8  ;;  %v598_v56 = vrot.slane %v3443_v8, 6 }
 0x210   :  { %v2900_v20 = vpop.eup %2899 }
 0x211   :  { %393 = vrot.lane.b32.xlu1 %v2900_v20, %s3102_s20 }
 0x215   :  { %402 = vrot.lane.b32.xlu1 %v2213_v23, %s3103_s22 }
 0x283   :  { %v394_v24 = vpop.permute.xlu1 %393 }
 0x284   :  { %v396_v25 = vmul.f32 %v2898_v1, %v394_v24 }
 0x286   :  { %398 = vrot.lane.b32.xlu0 %v396_v25, %s3103_s22 }
 0x287   :  { %v403_v26 = vpop.permute.xlu1 %402 }
 0x2f8   :  { %v399_v27 = vpop.permute.xlu0 %398 }
 0x2f9   :  { %v405_v28 = vsel %vm294_vm1, %v399_v27, %v403_v26  ;;  %2446 = vmatmul.mubr.msk.f32.vlgmr.msra.gmra.mrb[4].mxu1 %vm294_vm1, %v399_v27 }
 0x2fa   :  { %2435 = vmatmul.mubr.msk.f32.vlgmr.msra.gmra.mrb[6].mxu0 %vm412_vm4, %v405_v28  ;;  %2767 = vmatpush3.bf16.msra.mxu1 %v3360_v22 }
 0x2fb   :  { %2755 = vmatpush3.bf16.msra.mxu0 %v3455_v12  ;;  %2768 = vmatprep.subr.bf16.mxu1 %v3099_v3 }
 0x2fc   :  { %2756 = vmatprep.subr.bf16.mxu0 %v3099_v3  ;;  %2464 = vmatprep.mubr.msk.f32.mxu0 %vm3100_vm2, %v3101_v36 }
 0x2fd   :  { %2475 = vmatprep.mubr.msk.f32.mxu1 %vm3100_vm2, %v3101_v36 }
 0x2fe   :  { %2770 = vmatpush3.bf16.msra.mxu1 %v3380_v29 }
 0x2ff   :  { %2758 = vmatpush3.bf16.msra.mxu0 %v3461_v14  ;;  %2771 = vmatprep.subr.bf16.mxu1 %v3099_v3 }
 0x300   :  { %2759 = vmatprep.subr.bf16.mxu0 %v3099_v3 }
 0x303   :  { %2761 = vmatpush3.bf16.msra.mxu0 %v3471_v17 }
 0x304   :  { %2762 = vmatprep.subr.bf16.mxu0 %v3099_v3 }
 0x307   :  { %2764 = vmatpush3.bf16.msra.mxu0 %v3482_v21 }
 0x308   :  { %2783 = vmatprep.subr.bf16.mxu0 %v3099_v3 }
 0x3cc   :  { %v582_v31 = vpop.f32.mrb[4].mxu1 }
 0x3cd   :  { %v587_v32 = vrot.slane %v582_v31, 6  ;;  %v482_v33 = vpop.f32.mrb[6].mxu0  ;;  %v2447_v34 = vpop.f32.mrb[5].mxu1 }
 0x3ce   :  { %v483_v35 = vadd.f32 %v3514_v30, %v482_v33  ;;  %v2436_v37 = vpop.f32.mrb[7].mxu0 }
 0x3cf   :  { %v589_v38 = vadd.f32 %v587_v32, %v3432_v54 }
 0x3d0   :  { %2901 = vtanh.f32 %v483_v35  ;;  %v2219_v42 = vmul.f32 -1.442695, %v483_v35 }
 0x3d1   :  { %2903 = vtanh.f32 %v589_v38  ;;  %v2221_v43 = vmul.f32 -1.442695, %v589_v38 }
 0x3d2   :  { %2905 = vpow2.f32 %v2219_v42 }
 0x3d3   :  { %2907 = vpow2.f32 %v2221_v43 }
 0x3da   :  { %v2902_v39 = vpop.eup %2901 }
 0x3db   :  { %v2904_v40 = vpop.eup %2903  ;;  %499 = vrot.lane.b32.xlu0 %v2902_v39, %s3102_s20 }
 0x3dc   :  { %602 = vrot.lane.b32.xlu1 %v2904_v40, %s3102_s20  ;;  %v2906_v44 = vpop.eup %2905 }
 0x3dd   :  { %v2908_v45 = vpop.eup %2907  ;;  %v489_v46 = vadd.f32 1.0, %v2906_v44 }
 0x3de   :  { %v593_v47 = vadd.f32 1.0, %v2908_v45 }
 0x3df   :  { %494 = vrot.lane.b32.xlu0 %v2214_v41, %s3103_s22  ;;  %2909 = vrcp.f32 %v489_v46 }
 0x3e0   :  { %2911 = vrcp.f32 %v593_v47 }
 0x3e9   :  { %v2910_v48 = vpop.eup %2909 }
 0x3ea   :  { %v2912_v50 = vpop.eup %2911 }
 0x3eb   :  { %v600_v60 = vmul.f32 %v2912_v50, %v598_v56 }
 0x44d   :  { %v500_v49 = vpop.permute.xlu0 %499 }
 0x44e   :  { %v502_v51 = vmul.f32 %v2910_v48, %v500_v49  ;;  %v603_v52 = vpop.permute.xlu1 %602 }
 0x44f   :  { %v605_v53 = vmul.f32 %v2912_v50, %v603_v52 }
 0x450   :  { %504 = vrot.lane.b32.xlu1 %v502_v51, %s3103_s22 }
 0x451   :  { %607 = vrot.lane.b32.xlu0 %v605_v53, %s3103_s22  ;;  %v495_v55 = vpop.permute.xlu0 %494 }
 0x452   :  { %v497_v57 = vmul.f32 %v2910_v48, %v495_v55 }
 0x4c2   :  { %v505_v59 = vpop.permute.xlu1 %504 }
 0x4c3   :  { %v3527_v61 = vadd.f32 %v505_v59, %v497_v57  ;;  %v608_v62 = vpop.permute.xlu0 %607 }
 0x4c4   :  { %v3529_v63 = vadd.f32 %v608_v62, %v600_v60 }
 0x4c5   :  { %2913 = vtanh.f32 %v3527_v61 }
 0x4c6   :  { %2915 = vtanh.f32 %v3529_v63  ;;  %v812_v44 = vrot.slane %v3529_v63, 6 }
 0x4cf   :  { %v2914_v0 = vpop.eup %2913 }
 0x4d0   :  { %v2916_v1 = vpop.eup %2915  ;;  %510 = vrot.lane.b32.xlu1 %v2914_v0, %s3102_s20 }
 0x4d1   :  { %613 = vrot.lane.b32.xlu0 %v2916_v1, %s3102_s20 }
 0x542   :  { %v511_v2 = vpop.permute.xlu1 %510 }
 0x543   :  { %v3535_v4 = vmul.f32 %v2910_v48, %v511_v2  ;;  %v614_v5 = vpop.permute.xlu0 %613 }
 0x544   :  { %v616_v6 = vmul.f32 %v2912_v50, %v614_v5 }
 0x545   :  { %v622_v7 = vrot.slane %v3535_v4, 6 }
 0x546   :  { %618 = vrot.lane.b32.xlu1 %v616_v6, %s3103_s22  ;;  %v725_v8 = vrot.slane %v616_v6, 2 }
 0x547   :  { %623 = vrot.lane.b32.xlu0 %v622_v7, %s3102_s20 }
 0x54a   :  { %726 = vrot.lane.b32.xlu1 %v725_v8, %s3103_s22 }
 0x5b8   :  { %v619_v9 = vpop.permute.xlu1 %618 }
 0x5b9   :  { %v624_v10 = vpop.permute.xlu0 %623 }
 0x5ba   :  { %v626_v11 = vsel %vm294_vm1, %v619_v9, %v624_v10 }
 0x5bb   :  { %v628_v13 = vrot.slane %v626_v11, 2 }
 0x5bc   :  { %v727_v15 = vpop.permute.xlu1 %726 }
 0x5bd   :  { %2465 = vmatmul.mubr.msk.f32.vlgmr.msra.gmra.mrb[8].mxu0 %vm412_vm4, %v628_v13  ;;  %2476 = vmatmul.mubr.msk.f32.vlgmr.msra.gmra.mrb[6].mxu1 %vm294_vm1, %v727_v15 }
 0x5be   :  { %2773 = vmatpush3.bf16.msra.mxu1 %v3455_v12  ;;  %2785 = vmatpush3.bf16.msra.mxu0 %v3360_v22 }
 0x5bf   :  { %2774 = vmatprep.subr.bf16.mxu1 %v3099_v3  ;;  %2786 = vmatprep.subr.bf16.mxu0 %v3099_v3 }
 0x5c0   :  { %2494 = vmatprep.mubr.msk.f32.mxu1 %vm3100_vm2, %v3101_v36  ;;  %2505 = vmatprep.mubr.msk.f32.mxu0 %vm3100_vm2, %v3101_v36 }
 0x5c2   :  { %2776 = vmatpush3.bf16.msra.mxu1 %v3461_v14  ;;  %2788 = vmatpush3.bf16.msra.mxu0 %v3380_v29 }
 0x5c3   :  { %2777 = vmatprep.subr.bf16.mxu1 %v3099_v3  ;;  %2789 = vmatprep.subr.bf16.mxu0 %v3099_v3 }
 0x5c6   :  { %2779 = vmatpush3.bf16.msra.mxu1 %v3471_v17 }
 0x5c7   :  { %2780 = vmatprep.subr.bf16.mxu1 %v3099_v3 }
 0x5ca   :  { %2782 = vmatpush3.bf16.msra.mxu1 %v3482_v21 }
 0x5cb   :  { %2801 = vmatprep.subr.bf16.mxu1 %v3099_v3 }
 0x690   :  { %v697_v16 = vpop.f32.mrb[8].mxu0  ;;  %v796_v18 = vpop.f32.mrb[6].mxu1 }
 0x691   :  { %v698_v19 = vadd.f32 %v3514_v30, %v697_v16  ;;  %v801_v20 = vrot.slane %v796_v18, 4  ;;  %v2466_v23 = vpop.f32.mrb[9].mxu0  ;;  %v2477_v24 = vpop.f32.mrb[7].mxu1 }
 0x693   :  { %2917 = vtanh.f32 %v698_v19  ;;  %v803_v25 = vadd.f32 %v801_v20, %v3432_v54  ;;  %v2223_v28 = vmul.f32 -1.442695, %v698_v19 }
 0x695   :  { %2919 = vtanh.f32 %v803_v25  ;;  %v2225_v31 = vmul.f32 -1.442695, %v803_v25 }
 0x696   :  { %2921 = vpow2.f32 %v2223_v28 }
 0x697   :  { %2923 = vpow2.f32 %v2225_v31 }
 0x69d   :  { %v2918_v26 = vpop.eup %2917 }
 0x69e   :  { %710 = vrot.lane.b32.xlu0 %v2918_v26, %s3102_s20 }
 0x69f   :  { %v2920_v27 = vpop.eup %2919 }
 0x6a0   :  { %816 = vrot.lane.b32.xlu1 %v2920_v27, %s3102_s20  ;;  %v2922_v32 = vpop.eup %2921 }
 0x6a1   :  { %v2924_v33 = vpop.eup %2923  ;;  %v704_v34 = vadd.f32 1.0, %v2922_v32 }
 0x6a2   :  { %v807_v35 = vadd.f32 1.0, %v2924_v33 }
 0x6a3   :  { %2925 = vrcp.f32 %v704_v34 }
 0x6a4   :  { %2927 = vrcp.f32 %v807_v35 }
 0x6ad   :  { %v2926_v37 = vpop.eup %2925 }
 0x6ae   :  { %v2928_v40 = vpop.eup %2927  ;;  %v708_v43 = vmul.f32 %v2926_v37, %v3527_v61 }
 0x6af   :  { %v814_v47 = vmul.f32 %v2928_v40, %v812_v44 }
 0x710   :  { %v711_v38 = vpop.permute.xlu0 %710 }
 0x711   :  { %v713_v39 = vmul.f32 %v2926_v37, %v711_v38 }
 0x712   :  { %v817_v41 = vpop.permute.xlu1 %816 }
 0x713   :  { %715 = vrot.lane.b32.xlu0 %v713_v39, %s3103_s22  ;;  %v819_v42 = vmul.f32 %v2928_v40, %v817_v41 }
 0x715   :  { %821 = vrot.lane.b32.xlu1 %v819_v42, %s3103_s22 }
 0x785   :  { %v716_v45 = vpop.permute.xlu0 %715 }
 0x786   :  { %v3568_v46 = vadd.f32 %v716_v45, %v708_v43 }
 0x787   :  { %v822_v48 = vpop.permute.xlu1 %821 }
 0x788   :  { %2929 = vtanh.f32 %v3568_v46  ;;  %v3571_v49 = vadd.f32 %v822_v48, %v814_v47 }
 0x78a   :  { %2931 = vtanh.f32 %v3571_v49  ;;  %v1026_v31 = vrot.slane %v3571_v49, 6 }
 0x792   :  { %v2930_v50 = vpop.eup %2929 }
 0x793   :  { %721 = vrot.lane.b32.xlu0 %v2930_v50, %s3102_s20 }
 0x794   :  { %v2932_v51 = vpop.eup %2931 }
 0x795   :  { %827 = vrot.lane.b32.xlu1 %v2932_v51, %s3102_s20 }
 0x805   :  { %v722_v52 = vpop.permute.xlu0 %721 }
 0x806   :  { %v3576_v53 = vmul.f32 %v2926_v37, %v722_v52 }
 0x807   :  { %v828_v56 = vpop.permute.xlu1 %827 }
 0x808   :  { %v836_v55 = vrot.slane %v3576_v53, 4  ;;  %v830_v57 = vmul.f32 %v2928_v40, %v828_v56  ;;  %v2001_v40 = vrot.slane %v3576_v53, 6 }
 0x80a   :  { %837 = vrot.lane.b32.xlu1 %v836_v55, %s3102_s20  ;;  %832 = vrot.lane.b32.xlu0 %v830_v57, %s3103_s22  ;;  %v939_v59 = vrot.slane %v830_v57, 4  ;;  %v2015_v47 = vsel %vm2014_vm5, %v3535_v4, %v2001_v40 }
 0x80e   :  { %940 = vrot.lane.b32.xlu0 %v939_v59, %s3103_s22 }
 0x87c   :  { %v838_v60 = vpop.permute.xlu1 %837  ;;  %v833_v61 = vpop.permute.xlu0 %832 }
 0x87d   :  { %v840_v62 = vsel %vm294_vm1, %v833_v61, %v838_v60 }
 0x87e   :  { %v842_v63 = vrot.slane %v840_v62, 4 }
 0x880   :  { %v941_v0 = vpop.permute.xlu0 %940  ;;  %2495 = vmatmul.mubr.msk.f32.vlgmr.msra.gmra.mrb[8].mxu1 %vm412_vm4, %v842_v63 }
 0x881   :  { %2506 = vmatmul.mubr.msk.f32.vlgmr.msra.gmra.mrb[10].mxu0 %vm294_vm1, %v941_v0  ;;  %2803 = vmatpush3.bf16.msra.mxu1 %v3360_v22 }
 0x882   :  { %2791 = vmatpush3.bf16.msra.mxu0 %v3455_v12  ;;  %2804 = vmatprep.subr.bf16.mxu1 %v3099_v3 }
 0x883   :  { %2792 = vmatprep.subr.bf16.mxu0 %v3099_v3  ;;  %2524 = vmatprep.mubr.msk.f32.mxu0 %vm3100_vm2, %v3101_v36 }
 0x884   :  { %2535 = vmatprep.mubr.msk.f32.mxu1 %vm3100_vm2, %v3101_v36 }
 0x885   :  { %2806 = vmatpush3.bf16.msra.mxu1 %v3380_v29 }
 0x886   :  { %2794 = vmatpush3.bf16.msra.mxu0 %v3461_v14  ;;  %2807 = vmatprep.subr.bf16.mxu1 %v3099_v3 }
 0x887   :  { %2795 = vmatprep.subr.bf16.mxu0 %v3099_v3 }
 0x88a   :  { %2797 = vmatpush3.bf16.msra.mxu0 %v3471_v17 }
 0x88b   :  { %2798 = vmatprep.subr.bf16.mxu0 %v3099_v3 }
 0x88e   :  { %2800 = vmatpush3.bf16.msra.mxu0 %v3482_v21 }
 0x88f   :  { %2819 = vmatprep.subr.bf16.mxu0 %v3099_v3 }
 0x953   :  { %v911_v1 = vpop.f32.mrb[8].mxu1 }
 0x954   :  { %v912_v2 = vadd.f32 %v3514_v30, %v911_v1  ;;  %v2496_v5 = vpop.f32.mrb[9].mxu1  ;;  %v1010_v6 = vpop.f32.mrb[10].mxu0 }
 0x955   :  { %v1015_v7 = vrot.slane %v1010_v6, 2  ;;  %v2507_v8 = vpop.f32.mrb[11].mxu0 }
 0x956   :  { %2933 = vtanh.f32 %v912_v2  ;;  %v2227_v13 = vmul.f32 -1.442695, %v912_v2 }
 0x957   :  { %v1017_v9 = vadd.f32 %v1015_v7, %v3432_v54 }
 0x959   :  { %2935 = vtanh.f32 %v1017_v9  ;;  %v2229_v15 = vmul.f32 -1.442695, %v1017_v9 }
 0x95a   :  { %2937 = vpow2.f32 %v2227_v13 }
 0x95b   :  { %2939 = vpow2.f32 %v2229_v15 }
 0x960   :  { %v2934_v10 = vpop.eup %2933 }
 0x961   :  { %924 = vrot.lane.b32.xlu1 %v2934_v10, %s3102_s20 }
 0x963   :  { %v2936_v11 = vpop.eup %2935 }
 0x964   :  { %1030 = vrot.lane.b32.xlu0 %v2936_v11, %s3102_s20  ;;  %v2938_v16 = vpop.eup %2937 }
 0x965   :  { %v2940_v18 = vpop.eup %2939  ;;  %v918_v19 = vadd.f32 1.0, %v2938_v16 }
 0x966   :  { %v1021_v20 = vadd.f32 1.0, %v2940_v18 }
 0x967   :  { %2941 = vrcp.f32 %v918_v19 }
 0x968   :  { %2943 = vrcp.f32 %v1021_v20 }
 0x971   :  { %v2942_v23 = vpop.eup %2941 }
 0x972   :  { %v2944_v25 = vpop.eup %2943  ;;  %v922_v28 = vmul.f32 %v2942_v23, %v3568_v46 }
 0x973   :  { %v1028_v34 = vmul.f32 %v2944_v25, %v1026_v31 }
 0x9d3   :  { %v925_v24 = vpop.permute.xlu1 %924 }
 0x9d4   :  { %v927_v54 = vmul.f32 %v2942_v23, %v925_v24 }
 0x9d6   :  { %v1031_v26 = vpop.permute.xlu0 %1030  ;;  %929 = vrot.lane.b32.xlu1 %v927_v54, %s3103_s22 }
 0x9d7   :  { %v1033_v27 = vmul.f32 %v2944_v25, %v1031_v26 }
 0x9d9   :  { %1035 = vrot.lane.b32.xlu0 %v1033_v27, %s3103_s22 }
 0xa48   :  { %v930_v32 = vpop.permute.xlu1 %929 }
 0xa49   :  { %v3609_v33 = vadd.f32 %v930_v32, %v922_v28 }
 0xa4b   :  { %2945 = vtanh.f32 %v3609_v33  ;;  %v1036_v35 = vpop.permute.xlu0 %1035 }
 0xa4c   :  { %v3612_v37 = vadd.f32 %v1036_v35, %v1028_v34 }
 0xa4e   :  { %2947 = vtanh.f32 %v3612_v37  ;;  %v1237_v16 = vrot.slane %v3612_v37, 6 }
 0xa55   :  { %v2946_v38 = vpop.eup %2945 }
 0xa56   :  { %935 = vrot.lane.b32.xlu1 %v2946_v38, %s3102_s20 }
 0xa58   :  { %v2948_v39 = vpop.eup %2947 }
 0xa59   :  { %1041 = vrot.lane.b32.xlu0 %v2948_v39, %s3102_s20 }
 0xac8   :  { %v936_v41 = vpop.permute.xlu1 %935 }
 0xac9   :  { %v938_v42 = vmul.f32 %v2942_v23, %v936_v41 }
 0xacb   :  { %v1050_v43 = vrot.slane %v938_v42, 2  ;;  %v2003_v44 = vrot.slane %v938_v42, 4  ;;  %v1042_v45 = vpop.permute.xlu0 %1041 }
 0xacc   :  { %v1044_v46 = vmul.f32 %v2944_v25, %v1042_v45 }
 0xacd   :  { %1051 = vrot.lane.b32.xlu0 %v1050_v43, %s3102_s20  ;;  %v3622_v48 = vsel %vm2016_vm6, %v2015_v47, %v2003_v44 }
 0xace   :  { %1046 = vrot.lane.b32.xlu1 %v1044_v46, %s3103_s22  ;;  %v1153_v49 = vrot.slane %v1044_v46, 6 }
 0xad2   :  { %1154 = vrot.lane.b32.xlu1 %v1153_v49, %s3103_s22 }
 0xb3f   :  { %v1052_v50 = vpop.permute.xlu0 %1051 }
 0xb40   :  { %v1047_v51 = vpop.permute.xlu1 %1046 }
 0xb41   :  { %v1054_v52 = vsel %vm294_vm1, %v1047_v51, %v1052_v50 }
 0xb42   :  { %v1056_v53 = vrot.slane %v1054_v52, 6 }
 0xb44   :  { %2525 = vmatmul.mubr.msk.f32.vlgmr.msra.gmra.mrb[12].mxu0 %vm412_vm4, %v1056_v53  ;;  %v1155_v55 = vpop.permute.xlu1 %1154 }
 0xb45   :  { %2536 = vmatmul.mubr.msk.f32.vlgmr.msra.gmra.mrb[10].mxu1 %vm294_vm1, %v1155_v55  ;;  %2821 = vmatpush3.bf16.msra.mxu0 %v3360_v22 }
 0xb46   :  { %2809 = vmatpush3.bf16.msra.mxu1 %v3455_v12  ;;  %2822 = vmatprep.subr.bf16.mxu0 %v3099_v3 }
 0xb47   :  { %2810 = vmatprep.subr.bf16.mxu1 %v3099_v3  ;;  %2565 = vmatprep.mubr.msk.f32.mxu0 %vm3100_vm2, %v3101_v36 }
 0xb48   :  { %2554 = vmatprep.mubr.msk.f32.mxu1 %vm3100_vm2, %v3101_v36 }
 0xb49   :  { %2824 = vmatpush3.bf16.msra.mxu0 %v3380_v29 }
 0xb4a   :  { %2812 = vmatpush3.bf16.msra.mxu1 %v3461_v14  ;;  %2825 = vmatprep.subr.bf16.mxu0 %v3099_v3 }
 0xb4b   :  { %2813 = vmatprep.subr.bf16.mxu1 %v3099_v3 }
 0xb4e   :  { %2815 = vmatpush3.bf16.msra.mxu1 %v3471_v17 }
 0xb4f   :  { %2816 = vmatprep.subr.bf16.mxu1 %v3099_v3 }
 0xb52   :  { %2818 = vmatpush3.bf16.msra.mxu1 %v3482_v21 }
 0xb53   :  { %2837 = vmatprep.subr.bf16.mxu1 %v3099_v3 }
 0xc17   :  { %v1125_v4 = vpop.f32.mrb[12].mxu0 }
 0xc18   :  { %v1126_v56 = vadd.f32 %v3514_v30, %v1125_v4  ;;  %v2526_v57 = vpop.f32.mrb[13].mxu0  ;;  %v1224_v59 = vpop.f32.mrb[10].mxu1 }
 0xc19   :  { %v1228_v60 = vadd.f32 %v1224_v59, %v3435_v58  ;;  %v2537_v61 = vpop.f32.mrb[11].mxu1 }
 0xc1a   :  { %2949 = vtanh.f32 %v1126_v56  ;;  %v2231_v0 = vmul.f32 -1.442695, %v1126_v56 }
 0xc1b   :  { %2951 = vtanh.f32 %v1228_v60  ;;  %v2233_v1 = vmul.f32 -1.442695, %v1228_v60 }
 0xc1c   :  { %2953 = vpow2.f32 %v2231_v0 }
 0xc1d   :  { %2955 = vpow2.f32 %v2233_v1 }
 0xc24   :  { %v2950_v62 = vpop.eup %2949 }
 0xc25   :  { %v2952_v63 = vpop.eup %2951  ;;  %1138 = vrot.lane.b32.xlu0 %v2950_v62, %s3102_s20 }
 0xc26   :  { %1241 = vrot.lane.b32.xlu1 %v2952_v63, %s3102_s20  ;;  %v2954_v2 = vpop.eup %2953 }
 0xc27   :  { %v2956_v5 = vpop.eup %2955  ;;  %v1132_v6 = vadd.f32 1.0, %v2954_v2 }
 0xc28   :  { %v1232_v7 = vadd.f32 1.0, %v2956_v5 }
 0xc29   :  { %2957 = vrcp.f32 %v1132_v6 }
 0xc2a   :  { %2959 = vrcp.f32 %v1232_v7 }
 0xc33   :  { %v2958_v8 = vpop.eup %2957 }
 0xc34   :  { %v2960_v10 = vpop.eup %2959  ;;  %v1136_v18 = vmul.f32 %v2958_v8, %v3609_v33 }
 0xc35   :  { %v1239_v20 = vmul.f32 %v2960_v10, %v1237_v16 }
 0xc97   :  { %v1139_v9 = vpop.permute.xlu0 %1138 }
 0xc98   :  { %v1141_v11 = vmul.f32 %v2958_v8, %v1139_v9  ;;  %v1242_v13 = vpop.permute.xlu1 %1241 }
 0xc99   :  { %v1244_v15 = vmul.f32 %v2960_v10, %v1242_v13 }
 0xc9a   :  { %1143 = vrot.lane.b32.xlu0 %v1141_v11, %s3103_s22 }
 0xc9b   :  { %1246 = vrot.lane.b32.xlu1 %v1244_v15, %s3103_s22 }
 0xd0c   :  { %v1144_v19 = vpop.permute.xlu0 %1143 }
 0xd0d   :  { %v3653_v23 = vadd.f32 %v1144_v19, %v1136_v18  ;;  %v1247_v24 = vpop.permute.xlu1 %1246 }
 0xd0e   :  { %v3655_v54 = vadd.f32 %v1247_v24, %v1239_v20 }
 0xd0f   :  { %2961 = vtanh.f32 %v3653_v23 }
 0xd10   :  { %2963 = vtanh.f32 %v3655_v54  ;;  %v1446_v61 = vrot.slane %v3655_v54, 6 }
 0xd19   :  { %v2962_v25 = vpop.eup %2961 }
 0xd1a   :  { %v2964_v26 = vpop.eup %2963  ;;  %1149 = vrot.lane.b32.xlu0 %v2962_v25, %s3102_s20 }
 0xd1b   :  { %1252 = vrot.lane.b32.xlu1 %v2964_v26, %s3102_s20 }
 0xd8c   :  { %v1150_v27 = vpop.permute.xlu0 %1149 }
 0xd8d   :  { %v1152_v28 = vmul.f32 %v2958_v8, %v1150_v27  ;;  %v1253_v31 = vpop.permute.xlu1 %1252 }
 0xd8e   :  { %v1255_v32 = vmul.f32 %v2960_v10, %v1253_v31 }
 0xd8f   :  { %v2005_v33 = vrot.slane %v1152_v28, 2  ;;  %1261 = vrot.lane.b32.xlu1 %v1152_v28, %s3102_s20 }
 0xd90   :  { %1257 = vrot.lane.b32.xlu0 %v1255_v32, %s3103_s22 }
 0xd91   :  { %v3665_v34 = vsel %vm2018_vm7, %v3622_v48, %v2005_v33 }
 0xe01   :  { %v1262_v35 = vpop.permute.xlu1 %1261 }
 0xe02   :  { %v1258_v37 = vpop.permute.xlu0 %1257 }
 0xe03   :  { %v1264_v38 = vsel %vm294_vm1, %v1258_v37, %v1262_v35  ;;  %2566 = vmatmul.mubr.msk.f32.vlgmr.msra.gmra.mrb[14].mxu0 %vm294_vm1, %v1258_v37 }
 0xe04   :  { %2555 = vmatmul.mubr.msk.f32.vlgmr.msra.gmra.mrb[12].mxu1 %vm412_vm4, %v1264_v38  ;;  %2827 = vmatpush3.bf16.msra.mxu0 %v3455_v12 }
 0xe05   :  { %2828 = vmatprep.subr.bf16.mxu0 %v3099_v3  ;;  %2839 = vmatpush3.bf16.msra.mxu1 %v3360_v22 }
 0xe06   :  { %2840 = vmatprep.subr.bf16.mxu1 %v3099_v3  ;;  %2584 = vmatprep.mubr.msk.f32.mxu0 %vm3100_vm2, %v3101_v36 }
 0xe07   :  { %2595 = vmatprep.mubr.msk.f32.mxu1 %vm3100_vm2, %v3101_v36 }
 0xe08   :  { %2830 = vmatpush3.bf16.msra.mxu0 %v3461_v14 }
 0xe09   :  { %2831 = vmatprep.subr.bf16.mxu0 %v3099_v3  ;;  %2842 = vmatpush3.bf16.msra.mxu1 %v3380_v29 }
 0xe0a   :  { %2843 = vmatprep.subr.bf16.mxu1 %v3099_v3 }
 0xe0c   :  { %2833 = vmatpush3.bf16.msra.mxu0 %v3471_v17 }
 0xe0d   :  { %2834 = vmatprep.subr.bf16.mxu0 %v3099_v3 }
 0xe10   :  { %2836 = vmatpush3.bf16.msra.mxu0 %v3482_v21 }
 0xe11   :  { %2855 = vmatprep.subr.bf16.mxu0 %v3099_v3 }
 0xed6   :  { %v1430_v39 = vpop.f32.mrb[14].mxu0 }
 0xed7   :  { %v1435_v40 = vrot.slane %v1430_v39, 6  ;;  %v1334_v41 = vpop.f32.mrb[12].mxu1  ;;  %v2567_v42 = vpop.f32.mrb[15].mxu0 }
 0xed8   :  { %v1335_v43 = vadd.f32 %v3514_v30, %v1334_v41  ;;  %v2556_v44 = vpop.f32.mrb[13].mxu1 }
 0xed9   :  { %v1437_v45 = vadd.f32 %v1435_v40, %v3435_v58 }
 0xeda   :  { %2965 = vtanh.f32 %v1335_v43  ;;  %v2235_v48 = vmul.f32 -1.442695, %v1335_v43 }
 0xedb   :  { %2967 = vtanh.f32 %v1437_v45  ;;  %v2237_v49 = vmul.f32 -1.442695, %v1437_v45 }
 0xedc   :  { %2969 = vpow2.f32 %v2235_v48 }
 0xedd   :  { %2971 = vpow2.f32 %v2237_v49 }
 0xee4   :  { %v2966_v46 = vpop.eup %2965 }
 0xee5   :  { %v2968_v47 = vpop.eup %2967  ;;  %1347 = vrot.lane.b32.xlu0 %v2966_v46, %s3102_s20 }
 0xee6   :  { %1450 = vrot.lane.b32.xlu1 %v2968_v47, %s3102_s20  ;;  %v2970_v50 = vpop.eup %2969 }
 0xee7   :  { %v2972_v51 = vpop.eup %2971  ;;  %v1341_v52 = vadd.f32 1.0, %v2970_v50 }
 0xee8   :  { %v1441_v53 = vadd.f32 1.0, %v2972_v51 }
 0xee9   :  { %2973 = vrcp.f32 %v1341_v52 }
 0xeea   :  { %2975 = vrcp.f32 %v1441_v53 }
 0xef3   :  { %v2974_v55 = vpop.eup %2973 }
 0xef4   :  { %v2976_v56 = vpop.eup %2975  ;;  %v1345_v62 = vmul.f32 %v2974_v55, %v3653_v23 }
 0xef5   :  { %v1448_v0 = vmul.f32 %v2976_v56, %v1446_v61 }
 0xf57   :  { %v1348_v4 = vpop.permute.xlu0 %1347 }
 0xf58   :  { %v1350_v57 = vmul.f32 %v2974_v55, %v1348_v4  ;;  %v1451_v59 = vpop.permute.xlu1 %1450 }
 0xf59   :  { %v1453_v60 = vmul.f32 %v2976_v56, %v1451_v59 }
 0xf5a   :  { %1352 = vrot.lane.b32.xlu0 %v1350_v57, %s3103_s22 }
 0xf5b   :  { %1455 = vrot.lane.b32.xlu1 %v1453_v60, %s3103_s22 }
 0xfcc   :  { %v1353_v63 = vpop.permute.xlu0 %1352 }
 0xfcd   :  { %v3694_v1 = vadd.f32 %v1353_v63, %v1345_v62  ;;  %v1456_v2 = vpop.permute.xlu1 %1455 }
 0xfce   :  { %v3696_v5 = vadd.f32 %v1456_v2, %v1448_v0 }
 0xfcf   :  { %2977 = vtanh.f32 %v3694_v1 }
 0xfd0   :  { %2979 = vtanh.f32 %v3696_v5  ;;  %v1660_v47 = vrot.slane %v3696_v5, 6 }
 0xfd9   :  { %v2978_v6 = vpop.eup %2977 }
 0xfda   :  { %v2980_v7 = vpop.eup %2979  ;;  %1358 = vrot.lane.b32.xlu0 %v2978_v6, %s3102_s20 }
 0xfdb   :  { %1461 = vrot.lane.b32.xlu1 %v2980_v7, %s3102_s20 }
0x104c   :  { %v1359_v8 = vpop.permute.xlu0 %1358 }
0x104d   :  { %v3702_v9 = vmul.f32 %v2974_v55, %v1359_v8  ;;  %v1462_v10 = vpop.permute.xlu1 %1461 }
0x104e   :  { %v1464_v11 = vmul.f32 %v2976_v56, %v1462_v10 }
0x104f   :  { %v1470_v13 = vrot.slane %v3702_v9, 6 }
0x1050   :  { %1466 = vrot.lane.b32.xlu0 %v1464_v11, %s3103_s22  ;;  %v1573_v15 = vrot.slane %v1464_v11, 2 }
0x1051   :  { %1471 = vrot.lane.b32.xlu1 %v1470_v13, %s3102_s20 }
0x1054   :  { %1574 = vrot.lane.b32.xlu0 %v1573_v15, %s3103_s22 }
0x10c2   :  { %v1467_v16 = vpop.permute.xlu0 %1466 }
0x10c3   :  { %v1472_v18 = vpop.permute.xlu1 %1471 }
0x10c4   :  { %v1474_v19 = vsel %vm294_vm1, %v1467_v16, %v1472_v18 }
0x10c5   :  { %v1476_v20 = vrot.slane %v1474_v19, 2 }
0x10c6   :  { %v1575_v23 = vpop.permute.xlu0 %1574 }
0x10c7   :  { %2585 = vmatmul.mubr.msk.f32.vlgmr.msra.gmra.mrb[16].mxu0 %vm412_vm4, %v1476_v20  ;;  %2596 = vmatmul.mubr.msk.f32.vlgmr.msra.gmra.mrb[14].mxu1 %vm294_vm1, %v1575_v23 }
0x10c8   :  { %2845 = vmatpush3.bf16.msra.mxu1 %v3455_v12  ;;  %2857 = vmatpush3.bf16.msra.mxu0 %v3360_v22 }
0x10c9   :  { %2846 = vmatprep.subr.bf16.mxu1 %v3099_v3  ;;  %2858 = vmatprep.subr.bf16.mxu0 %v3099_v3 }
0x10ca   :  { %2614 = vmatprep.mubr.msk.f32.mxu1 %vm3100_vm2, %v3101_v36  ;;  %2625 = vmatprep.mubr.msk.f32.mxu0 %vm3100_vm2, %v3101_v36 }
0x10cc   :  { %2848 = vmatpush3.bf16.msra.mxu1 %v3461_v14  ;;  %2860 = vmatpush3.bf16.msra.mxu0 %v3380_v29 }
0x10cd   :  { %2849 = vmatprep.subr.bf16.mxu1 %v3099_v3  ;;  %2861 = vmatprep.subr.bf16.mxu0 %v3099_v3 }
0x10d0   :  { %2851 = vmatpush3.bf16.msra.mxu1 %v3471_v17 }
0x10d1   :  { %2852 = vmatprep.subr.bf16.mxu1 %v3099_v3 }
0x10d4   :  { %2854 = vmatpush3.bf16.msra.mxu1 %v3482_v21 }
0x119a   :  { %v1545_v22 = vpop.f32.mrb[16].mxu0  ;;  %v1644_v24 = vpop.f32.mrb[14].mxu1 }
0x119b   :  { %v1546_v54 = vadd.f32 %v3514_v30, %v1545_v22  ;;  %v1649_v25 = vrot.slane %v1644_v24, 4  ;;  %v2586_v26 = vpop.f32.mrb[17].mxu0  ;;  %v2597_v27 = vpop.f32.mrb[15].mxu1 }
0x119d   :  { %2981 = vtanh.f32 %v1546_v54  ;;  %v1651_v29 = vadd.f32 %v1649_v25, %v3435_v58  ;;  %v2239_v32 = vmul.f32 -1.442695, %v1546_v54 }
0x119f   :  { %2983 = vtanh.f32 %v1651_v29  ;;  %v2241_v33 = vmul.f32 -1.442695, %v1651_v29 }
0x11a0   :  { %2985 = vpow2.f32 %v2239_v32 }
0x11a1   :  { %2987 = vpow2.f32 %v2241_v33 }
0x11a7   :  { %v2982_v28 = vpop.eup %2981 }
0x11a8   :  { %1558 = vrot.lane.b32.xlu1 %v2982_v28, %s3102_s20 }
0x11a9   :  { %v2984_v31 = vpop.eup %2983 }
0x11aa   :  { %1664 = vrot.lane.b32.xlu0 %v2984_v31, %s3102_s20  ;;  %v2986_v35 = vpop.eup %2985 }
0x11ab   :  { %v2988_v37 = vpop.eup %2987  ;;  %v1552_v38 = vadd.f32 1.0, %v2986_v35 }
0x11ac   :  { %v1655_v39 = vadd.f32 1.0, %v2988_v37 }
0x11ad   :  { %2989 = vrcp.f32 %v1552_v38 }
0x11ae   :  { %2991 = vrcp.f32 %v1655_v39 }
0x11b7   :  { %v2990_v40 = vpop.eup %2989 }
0x11b8   :  { %v2992_v43 = vpop.eup %2991  ;;  %v1556_v46 = vmul.f32 %v2990_v40, %v3694_v1 }
0x11b9   :  { %v1662_v50 = vmul.f32 %v2992_v43, %v1660_v47 }
0x121a   :  { %v1559_v41 = vpop.permute.xlu1 %1558 }
0x121b   :  { %v1561_v42 = vmul.f32 %v2990_v40, %v1559_v41 }
0x121c   :  { %v1665_v44 = vpop.permute.xlu0 %1664 }
0x121d   :  { %1563 = vrot.lane.b32.xlu1 %v1561_v42, %s3103_s22  ;;  %v1667_v45 = vmul.f32 %v2992_v43, %v1665_v44 }
0x121f   :  { %1669 = vrot.lane.b32.xlu0 %v1667_v45, %s3103_s22 }
0x128f   :  { %v1564_v48 = vpop.permute.xlu1 %1563 }
0x1290   :  { %v3734_v49 = vadd.f32 %v1564_v48, %v1556_v46 }
0x1291   :  { %v1670_v51 = vpop.permute.xlu0 %1669 }
0x1292   :  { %2993 = vtanh.f32 %v3734_v49  ;;  %v3737_v52 = vadd.f32 %v1670_v51, %v1662_v50 }
0x1294   :  { %2995 = vtanh.f32 %v3737_v52  ;;  %v1874_v54 = vrot.slane %v3737_v52, 6 }
0x129c   :  { %v2994_v53 = vpop.eup %2993 }
0x129d   :  { %1569 = vrot.lane.b32.xlu1 %v2994_v53, %s3102_s20 }
0x129e   :  { %v2996_v55 = vpop.eup %2995 }
0x129f   :  { %1675 = vrot.lane.b32.xlu0 %v2996_v55, %s3102_s20 }
0x130f   :  { %v1570_v4 = vpop.permute.xlu1 %1569 }
0x1310   :  { %v3742_v56 = vmul.f32 %v2990_v40, %v1570_v4 }
0x1311   :  { %v1676_v59 = vpop.permute.xlu0 %1675 }
0x1312   :  { %v1684_v57 = vrot.slane %v3742_v56, 4  ;;  %v1678_v60 = vmul.f32 %v2992_v43, %v1676_v59  ;;  %v2007_v33 = vrot.slane %v3742_v56, 6 }
0x1314   :  { %1685 = vrot.lane.b32.xlu0 %v1684_v57, %s3102_s20  ;;  %1680 = vrot.lane.b32.xlu1 %v1678_v60, %s3103_s22  ;;  %v1787_v61 = vrot.slane %v1678_v60, 4  ;;  %v2020_v42 = vsel %vm2014_vm5, %v3702_v9, %v2007_v33 }
0x1318   :  { %1788 = vrot.lane.b32.xlu1 %v1787_v61, %s3103_s22  ;;  %v2023_v61 = vld [vmem:[%s3883_s6] sm:$0xff] }
0x1386   :  { %v1686_v62 = vpop.permute.xlu0 %1685  ;;  %v1681_v63 = vpop.permute.xlu1 %1680 }
0x1387   :  { %v1688_v0 = vsel %vm294_vm1, %v1681_v63, %v1686_v62  ;;  %v2024_v62 = vld [vmem:[%s3883_s6 + $0x8] sm:$0xff]  ;;  %v2025_v63 = vld [vmem:[%s3883_s6 + $0x10] sm:$0xff] }
0x1388   :  { %v1690_v1 = vrot.slane %v1688_v0, 4  ;;  %v2026_v0 = vld [vmem:[%s3883_s6 + $0x18] sm:$0xff] }
0x138a   :  { %v1789_v2 = vpop.permute.xlu1 %1788  ;;  %2615 = vmatmul.mubr.msk.f32.vlgmr.msra.gmra.mrb[16].mxu1 %vm412_vm4, %v1690_v1  ;;  %v2877_v1 = vpack.c.bf16 %v2026_v0, %v2025_v63 }
0x138b   :  { %2626 = vmatmul.mubr.msk.f32.vlgmr.msra.gmra.mrb[18].mxu0 %vm294_vm1, %v1789_v2 }
0x138c   :  { %2863 = vmatpush3.bf16.msra.mxu0 %v3455_v12  ;;  %2644 = vmatprep.mubr.msk.f32.mxu0 %vm3100_vm2, %v3101_v36 }
0x138d   :  { %2864 = vmatprep.subr.bf16.mxu0 %v3099_v3 }
0x1390   :  { %2866 = vmatpush3.bf16.msra.mxu0 %v3461_v14 }
0x1391   :  { %2867 = vmatprep.subr.bf16.mxu0 %v3099_v3 }
0x1394   :  { %2869 = vmatpush3.bf16.msra.mxu0 %v3471_v17 }
0x1395   :  { %2870 = vmatprep.subr.bf16.mxu0 %v3099_v3 }
0x1398   :  { %2872 = vmatpush3.bf16.msra.mxu0 %v3482_v21 }
0x145d   :  { %v1759_v5 = vpop.f32.mrb[16].mxu1 }
0x145e   :  { %v1760_v6 = vadd.f32 %v3514_v30, %v1759_v5  ;;  %v2616_v7 = vpop.f32.mrb[17].mxu1  ;;  %v1858_v12 = vpop.f32.mrb[18].mxu0 }
0x145f   :  { %v1863_v8 = vrot.slane %v1858_v12, 2  ;;  %v2627_v10 = vpop.f32.mrb[19].mxu0 }
0x1460   :  { %2997 = vtanh.f32 %v1760_v6  ;;  %v2243_v3 = vmul.f32 -1.442695, %v1760_v6  ;;  %v2248_v10 = vld [vmem:[%s3884_s7] ss:$0 sm:$0xff]  ;;  %s3104_s7 = smov 96  }
0x1461   :  { %v1865_v36 = vadd.f32 %v1863_v8, %v3435_v58 }
0x1463   :  { %2999 = vtanh.f32 %v1865_v36  ;;  %v2245_v17 = vmul.f32 -1.442695, %v1865_v36 }
0x1464   :  { %3001 = vpow2.f32 %v2243_v3 }
0x1465   :  { %3003 = vpow2.f32 %v2245_v17 }
0x146a   :  { %v2998_v14 = vpop.eup %2997 }
0x146b   :  { %1772 = vrot.lane.b32.xlu0 %v2998_v14, %s3102_s20 }
0x146d   :  { %v3000_v11 = vpop.eup %2999 }
0x146e   :  { %1878 = vrot.lane.b32.xlu1 %v3000_v11, %s3102_s20  ;;  %v3002_v21 = vpop.eup %3001 }
0x146f   :  { %v3004_v13 = vpop.eup %3003  ;;  %v1766_v15 = vadd.f32 1.0, %v3002_v21 }
0x1470   :  { %v1869_v16 = vadd.f32 1.0, %v3004_v13 }
0x1471   :  { %3005 = vrcp.f32 %v1766_v15 }
0x1472   :  { %3007 = vrcp.f32 %v1869_v16 }
0x147b   :  { %v3006_v18 = vpop.eup %3005 }
0x147c   :  { %v3008_v20 = vpop.eup %3007  ;;  %v1770_v24 = vmul.f32 %v3006_v18, %v3734_v49 }
0x147d   :  { %v1876_v27 = vmul.f32 %v3008_v20, %v1874_v54 }
0x14dd   :  { %v1773_v19 = vpop.permute.xlu0 %1772 }
0x14de   :  { %v1775_v58 = vmul.f32 %v3006_v18, %v1773_v19 }
0x14e0   :  { %v1879_v23 = vpop.permute.xlu1 %1878  ;;  %1777 = vrot.lane.b32.xlu0 %v1775_v58, %s3103_s22 }
0x14e1   :  { %v1881_v22 = vmul.f32 %v3008_v20, %v1879_v23 }
0x14e3   :  { %1883 = vrot.lane.b32.xlu1 %v1881_v22, %s3103_s22 }
0x1552   :  { %v1778_v25 = vpop.permute.xlu0 %1777 }
0x1553   :  { %v1780_v26 = vadd.f32 %v1778_v25, %v1770_v24 }
0x1555   :  { %3009 = vtanh.f32 %v1780_v26  ;;  %v1884_v29 = vpop.permute.xlu1 %1883 }
0x1556   :  { %v3768_v28 = vadd.f32 %v1884_v29, %v1876_v27 }
0x1558   :  { %3011 = vtanh.f32 %v3768_v28 }
0x155f   :  { %v3010_v31 = vpop.eup %3009 }
0x1560   :  { %1783 = vrot.lane.b32.xlu0 %v3010_v31, %s3102_s20 }
0x1562   :  { %v3012_v32 = vpop.eup %3011 }
0x1563   :  { %1889 = vrot.lane.b32.xlu1 %v3012_v32, %s3102_s20 }
0x15d2   :  { %v1784_v35 = vpop.permute.xlu0 %1783 }
0x15d3   :  { %v1786_v37 = vmul.f32 %v3006_v18, %v1784_v35 }
0x15d5   :  { %v1898_v38 = vrot.slane %v1786_v37, 2  ;;  %v2009_v39 = vrot.slane %v1786_v37, 4  ;;  %v1890_v40 = vpop.permute.xlu1 %1889 }
0x15d6   :  { %v1892_v41 = vmul.f32 %v3008_v20, %v1890_v40 }
0x15d7   :  { %1899 = vrot.lane.b32.xlu1 %v1898_v38, %s3102_s20  ;;  %v2021_v43 = vsel %vm2016_vm6, %v2020_v42, %v2009_v39 }
0x15d8   :  { %1894 = vrot.lane.b32.xlu0 %v1892_v41, %s3103_s22 }
0x1649   :  { %v1900_v44 = vpop.permute.xlu1 %1899 }
0x164a   :  { %v1895_v45 = vpop.permute.xlu0 %1894 }
0x164b   :  { %v1902_v46 = vsel %vm294_vm1, %v1895_v45, %v1900_v44  ;;  %2144 = vst.msk [vmem:[#allocation4 - $0x6] sm:$0xc0] %vm2143_vm8, %v1895_v45 }
0x164c   :  { %v1904_v47 = vrot.slane %v1902_v46, 6 }
0x164e   :  { %2645 = vmatmul.mubr.msk.f32.vlgmr.msra.gmra.mrb[20].mxu0 %vm412_vm4, %v1904_v47 }
0x1721   :  { %v1973_v48 = vpop.f32.mrb[20].mxu0 }
0x1722   :  { %v1974_v49 = vadd.f32 %v3514_v30, %v1973_v48  ;;  %v2646_v9 = vpop.f32.mrb[21].mxu0 }
0x1724   :  { %3013 = vtanh.f32 %v1974_v49  ;;  %v2247_v51 = vmul.f32 -1.442695, %v1974_v49 }
0x1726   :  { %3015 = vpow2.f32 %v2247_v51 }
0x172e   :  { %v3014_v50 = vpop.eup %3013 }
0x172f   :  { %1986 = vrot.lane.b32.xlu0 %v3014_v50, %s3102_s20 }
0x1730   :  { %v3016_v52 = vpop.eup %3015 }
0x1731   :  { %v1980_v53 = vadd.f32 1.0, %v3016_v52 }
0x1733   :  { %3017 = vrcp.f32 %v1980_v53 }
0x173d   :  { %v3018_v55 = vpop.eup %3017 }
0x173e   :  { %v1984_v57 = vmul.f32 %v3018_v55, %v1780_v26 }
0x17a1   :  { %v1987_v4 = vpop.permute.xlu0 %1986 }
0x17a2   :  { %v1989_v56 = vmul.f32 %v3018_v55, %v1987_v4 }
0x17a4   :  { %1991 = vrot.lane.b32.xlu1 %v1989_v56, %s3103_s22 }
0x17a8   :  { %2036 = vrot.lane.b32.xlu1 %v3665_v34, %s3103_s22  ;;  %v2873_v34 = vpack.c.bf16 %v2024_v62, %v2023_v61 }
0x17aa   :  { %2874 = vmatprep.subr.bf16.mxu1 %v2873_v34 }
0x17ab   :  { %2876 = vmatpush3.bf16.msra.mxu1 %v2873_v34 }
0x17ac   :  { %2878 = vmatprep.subr.bf16.mxu1 %v2877_v1 }
0x17af   :  { %2880 = vmatpush3.bf16.msra.mxu1 %v2877_v1 }
0x1816   :  { %v1992_v30 = vpop.permute.xlu1 %1991 }
0x1817   :  { %v1994_v59 = vadd.f32 %v1992_v30, %v1984_v57 }
0x1819   :  { %3019 = vtanh.f32 %v1994_v59 }
0x181a   :  { %v2037_v60 = vpop.permute.xlu1 %2036 }
0x181b   :  { %2655 = vmatprep.mubr.msk.f32.mxu1 %vm294_vm1, %v2037_v60 }
0x1823   :  { %v3020_v2 = vpop.eup %3019 }
0x1824   :  { %1997 = vrot.lane.b32.xlu0 %v3020_v2, %s3102_s20  ;;  %s3105_s20 = smov [#allocation4]  }
0x1825   :  { %s2179_s29 = sshll.u32 %s3105_s20, 4  ;;  %s2180_s29 = int_to_ptr.vmem [resolvable:$true] %s2179_s29 }
0x1826   :  { %s3029_s14 = scalar_lea.vmem %s2180_s29, 64  ;;  %p3034_p1 = scmp.lt.s32.totalorder %s2180_s29, %s2180_s29 }
0x1827   :  { %p3030_p0 = scmp.ne.s32.totalorder %s2180_s29, %s3029_s14  ;;  %p3035_p2 = scmp.lt.s32.totalorder %s3029_s14, %s3029_s14 }
0x1829   :  { %p3036_p3 = por %p3035_p2, %p3034_p1 }
0x182b   :  { %p3037_p4 = pnand %p3036_p3, %p3030_p0 }
0x1896   :  { %v1998_v5 = vpop.permute.xlu0 %1997 }
0x1897   :  { %v2000_v6 = vmul.f32 %v3018_v55, %v1998_v5 }
0x1899   :  { %v2012_v7 = vrot.slane %v2000_v6, 2 }
0x189b   :  { %v2022_v12 = vsel %vm2018_vm7, %v2021_v43, %v2012_v7 }
0x189c   :  { %2038 = vrot.lane.b32.xlu0 %v2022_v12, %s3103_s22 }
0x190e   :  { %v2039_v8 = vpop.permute.xlu0 %2038 }
0x190f   :  { %2656 = vmatmul.mubr.msk.f32.vlgmr.msra.gmra.mrb[18].mxu1 %vm294_vm1, %v2039_v8 }
0x19e2   :  { %v2657_v36 = vpop.f32.mrb[18].mxu1 }
0x19e3   :  { %v3807_v14 = vadd.f32 %v2657_v36, %v2248_v10  ;;  %v2110_v11 = vpop.f32.mrb[19].mxu1 }
0x19e4   :  { %v3809_v3 = vadd.f32 %v2248_v10, %v2110_v11 }
0x19e5   :  { %2121 = vmax.xlane.f32.xlu0 %v3807_v14 }
0x19e6   :  { %2119 = vmax.xlane.f32.xlu1 %v3809_v3 }
0x1a72   :  { %v3813_v17 = vpop.xlane.xlu0 %2121 }
0x1a73   :  { %v2124_v21 = vsub.f32 %v3807_v14, %v3813_v17  ;;  %v3817_v13 = vpop.xlane.xlu1 %2119 }
0x1a74   :  { %v2123_v15 = vsub.f32 %v3809_v3, %v3817_v13 }
0x1a75   :  { %v2127_v16 = vmul.f32 1.442695, %v2124_v21 }
0x1a76   :  { %v2125_v18 = vmul.f32 1.442695, %v2123_v15 }
0x1a77   :  { %3021 = vpow2.f32 %v2127_v16 }
0x1a78   :  { %3023 = vpow2.f32 %v2125_v18 }
0x1a81   :  { %v3022_v19 = vpop.eup %3021 }
0x1a82   :  { %v3024_v58 = vpop.eup %3023  ;;  %2131 = vadd.xlane.f32.xlu1 %v3022_v19 }
0x1a83   :  { %2129 = vadd.xlane.f32.xlu0 %v3024_v58 }
0x1a93   :  { %2152 = vrot.lane.b32.xlu1 %v3768_v28, %s3104_s7 }
0x1a97   :  { %2157 = vrot.lane.b32.xlu1 %v1994_v59, %s3104_s7 }
0x1a99   :  { %2145 = vrot.lane.b32.xlu0 %v2000_v6, %s3103_s22 }
0x1b0f   :  { %v2132_v20 = vpop.xlane.xlu1 %2131 }
0x1b10   :  { %3025 = vlog2.f32 %v2132_v20  ;;  %v2130_v23 = vpop.xlane.xlu0 %2129 }
0x1b11   :  { %3027 = vlog2.f32 %v2130_v23 }
0x1b13   :  { %v2153_v22 = vpop.permute.xlu1 %2152 }
0x1b14   :  { %2155 = vst.msk [vmem:[#allocation6 - $0x6] sm:$0xc0] %vm2143_vm8, %v2153_v22  ;;  %v2146_v24 = vpop.permute.xlu0 %2145 }
0x1b15   :  { %2150 = vst.msk [vmem:[#allocation4 + $0x2] sm:$0x3] %vm2149_vm9, %v2146_v24 }
0x1b16   :  { %3040 = shalt.err (!%p3037_p4)
}
0x1b17   :  { %s3041_s17 = scalar_lea.hbm %s3888_s11, 64 }
0x1b18   :  { %p3042_p5 = scmp.ne.s32.totalorder %s3888_s11, %s3041_s17  ;;  %p3045_p6 = scmp.lt.u32.totalorder %s3041_s17, %s3888_s11 }
0x1b1a   :  { %p3047_p7 = pnand %p3045_p6, %p3042_p5 }
0x1b1c   :  { %3050 = shalt.err (!%p3047_p7)
}
0x1b1d   :  { %s3107_s4 = smov 2   ;;  %v2158_v54 = vpop.permute.xlu1 %2157  ;;  %s3051_s5 = scalar_lea.vmem %s3825_s13, 64 }
0x1b1e   :  { %2185 = dma.vmem_to_hbm [thread:$0]  %s2180_s29, 64, %s3888_s11, [#allocation5], %s3103_s22, %s3103_s22, %s3107_s4   ;;  %2161 = vst.msk [vmem:[#allocation6 + $0x2] sm:$0x3] %vm2149_vm9, %v2158_v54 }
0x1b1f   :  { %p3052_p8 = scmp.ne.s32.totalorder %s3825_s13, %s3051_s5  ;;  %p3056_p9 = scmp.lt.s32.totalorder %s3825_s13, %s3825_s13 }
0x1b20   :  { %p3057_p10 = scmp.lt.s32.totalorder %s3051_s5, %s3051_s5 }
0x1b22   :  { %p3058_p11 = por %p3057_p10, %p3056_p9 }
0x1b24   :  { %p3059_p12 = pnand %p3058_p11, %p3052_p8 }
0x1b26   :  { %3062 = shalt.err (!%p3059_p12)
}
0x1b27   :  { %s3063_s3 = scalar_lea.hbm %s3889_s12, 64 }
0x1b28   :  { %p3064_p13 = scmp.ne.s32.totalorder %s3889_s12, %s3063_s3  ;;  %p3067_p0 = scmp.lt.u32.totalorder %s3063_s3, %s3889_s12 }
0x1b2a   :  { %p3069_p1 = pnand %p3067_p0, %p3064_p13 }
0x1b2c   :  { %3072 = shalt.err (!%p3069_p1)
}
0x1b2d   :  { %2197 = dma.vmem_to_hbm [thread:$0]  %s3825_s13, 64, %s3889_s12, [#allocation5], %s3103_s22, %s3103_s22, %s3107_s4   ;;  %v3026_v25 = vpop.eup %3025 }
0x1b2e   :  { %v3028_v26 = vpop.eup %3027  ;;  %v2136_v27 = vmul.f32 0.6931472, %v3026_v25  ;;  %s3108_s28 = smov [#allocation2]  }
0x1b2f   :  { %v2134_v29 = vmul.f32 0.6931472, %v3028_v26  ;;  %s2167_s6 = sshll.u32 %s3108_s28, 4  ;;  %s2168_s6 = int_to_ptr.vmem [resolvable:$true] %s2167_s6 }
0x1b30   :  { %v2138_v28 = vadd.f32 %v2136_v27, %v3813_v17  ;;  %s3073_s7 = scalar_lea.vmem %s2168_s6, 256  ;;  %p3078_p3 = scmp.lt.s32.totalorder %s2168_s6, %s2168_s6 }
0x1b31   :  { %v2137_v31 = vadd.f32 %v2134_v29, %v3817_v13  ;;  %p3074_p2 = scmp.ne.s32.totalorder %s2168_s6, %s3073_s7  ;;  %p3079_p4 = scmp.lt.s32.totalorder %s3073_s7, %s3073_s7 }
0x1b32   :  { %v2140_v32 = vsub.f32 %v3807_v14, %v2138_v28 }
0x1b33   :  { %v2139_v33 = vsub.f32 %v3809_v3, %v2137_v31  ;;  %p3080_p5 = por %p3079_p4, %p3078_p3 }
0x1b34   :  { %2142 = vst [vmem:[#allocation2 + $0x8] sm:$0xff] %v2140_v32 }
0x1b35   :  { %2141 = vst [vmem:[#allocation2] sm:$0xff] %v2139_v33  ;;  %p3081_p6 = pnand %p3080_p5, %p3074_p2 }
0x1b37   :  { %3084 = shalt.err (!%p3081_p6)
}
0x1b38   :  { %s3085_s20 = scalar_lea.hbm %s3887_s10, 256 }
0x1b39   :  { %p3086_p7 = scmp.ne.s32.totalorder %s3887_s10, %s3085_s20  ;;  %p3089_p8 = scmp.lt.u32.totalorder %s3085_s20, %s3887_s10 }
0x1b3b   :  { %p3091_p9 = pnand %p3089_p8, %p3086_p7 }
0x1b3d   :  { %3094 = shalt.err (!%p3091_p9)
}
0x1b3e   :  { %s3109_s15 = smov 128   ;;  %s3110_s16 = smov 8  }
0x1b3f   :  { %2173 = dma.vmem_to_hbm [thread:$0]  %s2168_s6, 256, %s3887_s10, [#allocation3], %s3109_s15, %s3109_s15, %s3110_s16  }
0x1b40   :  { %3095 = dma.done.wait [#allocation3], 256  }
0x1b41   :  { %3096 = vsyncadd [#allocation3], 4294967040 }
0x1b42   :  { %3097 = dma.done.wait [#allocation5], 128  }
0x1b43   :  { %3098 = vsyncadd [#allocation5], 4294967168 }
0x1b44   :  { %2207 = vsyncpa [#allocation3], 1 }
0x1b45   :  { %2208 = vsyncpa [#allocation5], 1 }

</bundles_post_ra>
